<compile_context>
chip_gen: v7x
topology: tpu7x:2x2x1
jax: 0.10.0
libtpu: 0.0.40
codegen_flags: <defaults>
</compile_context>

<pallas_src>
import math

import numpy as np
import jax
import jax.numpy as jnp
from jax.experimental import pallas as pl
from jax.experimental.pallas import tpu as pltpu


# --------------------------------------------------------------------------
# Fused FcsAttention kernel
# --------------------------------------------------------------------------
def fcs_attention_forward(x, dct_flat, w1t, w2, tap_w):
    """x: (B, C, H, W) f32, tap_w: (49, 2*TB, H*W) f32 -> (B, C, H, W) f32."""
    B, C, H, W = x.shape
    HW = H * W
    Cr = w1t.shape[1]
    N_TAPS = 49                         # 7x7 spatial conv
    TB = tap_w.shape[1] // 2            # batches per grid step (encoded in the tap table)
    assert B % TB == 0, (B, TB)
    NB = B // TB

    def sigmoid(v):
        # Numerically stable sigmoid; tanh lives on the EUP slot (free alongside VALU work)
        # and avoids both the f32 divide and the inf intermediate of 1/(1+exp(-v)).
        return 0.5 * jnp.tanh(0.5 * v) + 0.5

    def kernel(x_ref, dct_ref, w1t_ref, w2_ref, aw_ref, out_ref):
        # Hoisted constant loads (VMEM-resident across the whole step).
        dct = dct_ref[...]                                            # (C, HW)
        w1t_v = w1t_ref[...]                                          # (C, Cr)
        w2_v = w2_ref[...]                                            # (C, Cr)

        # ---- per-batch multi-spectral (DCT) channel attention (tiny, 2D ops only) ----
        x1_list = []
        avg_rows = []
        max_rows = []
        for b in range(TB):                                           # static unroll, TB is small
            xb = x_ref[b]                                             # (C, HW)
            y = jnp.sum(xb * dct, axis=1, keepdims=True)              # (C, 1)   DCT "pooling"
            z = jnp.sum(w1t_v * y, axis=0, keepdims=True)             # (1, Cr)  fc1
            z = jnp.maximum(z, 0.0)                                   # ReLU
            z = jnp.sum(w2_v * z, axis=1, keepdims=True)              # (C, 1)   fc2
            x1 = xb * sigmoid(z)                                      # (C, HW)  channel gate
            x1_list.append(x1)
            avg_rows.append(jnp.mean(x1, axis=0, keepdims=True))      # (1, HW)
            max_rows.append(jnp.max(x1, axis=0, keepdims=True))       # (1, HW)

        # ---- spatial attention: 7x7 conv over [mean_c, max_c], zero padding ----
        # Packed slab: rows [0, TB) = avg of each batch, rows [TB, 2*TB) = max of each batch.
        slab = jnp.concatenate(avg_rows + max_rows, axis=0)           # (2*TB, HW)

        # 49 taps, one roll + one mul + one add each, 4 independent accumulators.
        accs = [jnp.zeros((2 * TB, HW), jnp.float32) for _ in range(4)]
        t = 0
        for dy in range(-3, 4):
            for dx in range(-3, 4):
                shift = (-(dy * W + dx)) % HW
                rolled = slab if shift == 0 else pltpu.roll(slab, shift=shift, axis=1)
                # Zero-pad boundary mask is pre-folded into the per-tap weight rows, so the
                # wrap-around of the flattened roll is multiplied by exact zeros.
                accs[t % 4] = accs[t % 4] + rolled * aw_ref[t]        # aw_ref[t]: (2*TB, HW)
                t += 1
        conv = (accs[0] + accs[1]) + (accs[2] + accs[3])              # (2*TB, HW)
        sp_logits = conv[0:TB, :] + conv[TB:2 * TB, :]                # avg + max contribs, (TB, HW)
        sp_att = sigmoid(sp_logits)                                   # (TB, HW)

        for b in range(TB):
            out_ref[b] = x1_list[b] * sp_att[b:b + 1, :]              # (C, HW) lane-dense store

    out = pl.pallas_call(
        kernel,
        out_shape=jax.ShapeDtypeStruct((B, C, HW), jnp.float32),
        grid=(NB,),
        in_specs=[
            pl.BlockSpec((TB, C, HW), lambda i: (i, 0, 0)),           # activations
            pl.BlockSpec((C, HW), lambda i: (0, 0)),                  # DCT filter
            pl.BlockSpec((C, Cr), lambda i: (0, 0)),                  # fc1 weight (transposed)
            pl.BlockSpec((C, Cr), lambda i: (0, 0)),                  # fc2 weight
            pl.BlockSpec((N_TAPS, 2 * TB, HW), lambda i: (0, 0, 0)),  # masked 7x7 tap rows
        ],
        out_specs=pl.BlockSpec((TB, C, HW), lambda i: (i, 0, 0)),
        compiler_params=pltpu.CompilerParams(
            dimension_semantics=("parallel",)),
    )(x.reshape(B, C, HW), dct_flat, w1t, w2, tap_w)
    return out.reshape(B, C, H, W)


def pick_batch_block(B):
    """Batches per grid step: whole batch on 1-TC chips (v5e/v6e), B/2 on 2-TC v7x."""
    try:
        kind = jax.devices()[0].device_kind.lower()
        n_tc = 2 if "v7" in kind else 1
    except Exception:  # pragma: no cover - defensive
        n_tc = 1
    nb = n_tc if (n_tc <= B and B % n_tc == 0) else 1
    return B // nb


# --------------------------------------------------------------------------
# Host-side constant tables (built once, outside the kernel)
# --------------------------------------------------------------------------
def get_freq_indices(method="top16"):
    num_freq = int(method[3:])
    all_top_indices_x = [0, 0, 6, 0, 0, 1, 1, 4, 5, 1, 3, 0, 0, 0, 3, 2,
                         4, 6, 3, 5, 5, 2, 6, 5, 5, 3, 3, 4, 2, 2, 6, 1]
    all_top_indices_y = [0, 1, 0, 5, 2, 0, 2, 0, 0, 6, 0, 4, 6, 3, 5, 2,
                         6, 3, 3, 3, 5, 1, 1, 2, 4, 2, 1, 1, 3, 0, 5, 3]
    return all_top_indices_x[:num_freq], all_top_indices_y[:num_freq]


def build_dct_filter(dct_h, dct_w, mapper_x, mapper_y, channel):
    """FcaNet MultiSpectralDCTLayer.get_dct_filter, flattened to (channel, dct_h*dct_w)."""
    def bf(pos, freq, length):
        r = math.cos(math.pi * freq * (pos + 0.5) / length) / math.sqrt(length)
        return r if freq == 0 else r * math.sqrt(2.0)

    filt = np.zeros((channel, dct_h, dct_w), np.float32)
    c_part = channel // len(mapper_x)
    for i, (ux, vy) in enumerate(zip(mapper_x, mapper_y)):
        for tx in range(dct_h):
            for ty in range(dct_w):
                filt[i * c_part:(i + 1) * c_part, tx, ty] = bf(tx, ux, dct_h) * bf(ty, vy, dct_w)
    return filt.reshape(channel, dct_h * dct_w)


def build_spatial_tap_weights(conv_w, H, W, tb=1):
    """(2, 7, 7) conv weight -> (49, 2*tb, H*W) rows of (zero-pad boundary mask * tap weight).

    For tap t, rows [0, tb) carry the avg-channel weight and rows [tb, 2*tb) the max-channel
    weight, matching the kernel's [avg_0..avg_{tb-1}, max_0..max_{tb-1}] slab layout.
    Tap ordering matches the unrolled (dy, dx) loop inside the kernel.
    """
    HW = H * W
    p = np.arange(HW)
    ph, pw = p // W, p % W
    rows = np.zeros((49, 2, HW), np.float32)
    t = 0
    for dy in range(-3, 4):
        for dx in range(-3, 4):
            valid = ((ph + dy >= 0) & (ph + dy < H)
                     & (pw + dx >= 0) & (pw + dx < W)).astype(np.float32)
            rows[t, 0] = conv_w[0, dy + 3, dx + 3] * valid
            rows[t, 1] = conv_w[1, dy + 3, dx + 3] * valid
            t += 1
    return np.repeat(rows, tb, axis=1)          # (49, 2*tb, HW)


# --------------------------------------------------------------------------
# Pure-numpy reference (mirrors the PyTorch module in f32)
# --------------------------------------------------------------------------
def reference_forward(x, dct_flat, w1, w2, conv_w):
    B, C, H, W = x.shape
    y = (x.reshape(B, C, H * W) * dct_flat[None]).sum(-1)             # (B, C)
    z = np.maximum(y @ w1.T, 0.0) @ w2.T                              # (B, C)
    ch_att = 1.0 / (1.0 + np.exp(-z))
    x1 = x * ch_att[:, :, None, None]
    avg = x1.mean(axis=1, keepdims=True)
    mx = x1.max(axis=1, keepdims=True)
    inp = np.concatenate([avg, mx], axis=1)                           # (B, 2, H, W)
    pad = np.pad(inp, ((0, 0), (0, 0), (3, 3), (3, 3)))
    s = np.zeros((B, 1, H, W), np.float32)
    for dy in range(7):
        for dx in range(7):
            s[:, 0] += (pad[:, 0, dy:dy + H, dx:dx + W] * conv_w[0, dy, dx]
                        + pad[:, 1, dy:dy + H, dx:dx + W] * conv_w[1, dy, dx])
    s = 1.0 / (1.0 + np.exp(-s))
    return x1 * s


# --------------------------------------------------------------------------
# Demo / self-check
# --------------------------------------------------------------------------
if __name__ == "__main__":
    # FcsAttention(in_channels, out_channels=64, img_size=256, reduction=16):
    #   c2wh[out_channels] = img_size // 16 = 16 -> dct_h = dct_w = 16
    # Input spatial size equals the DCT size, so adaptive_avg_pool2d is a no-op.
    B, C, H, W = 2, 64, 16, 16
    IMG_SIZE, REDUCTION = 256, 16
    dct_h = dct_w = IMG_SIZE // 16
    Cr = C // REDUCTION

    key = jax.random.PRNGKey(0)
    kx, kc, k1, k2 = jax.random.split(key, 4)
    x = jax.random.normal(kx, (B, C, H, W), jnp.float32)
    conv_w = jax.random.normal(kc, (2, 7, 7), jnp.float32) * (1.0 / math.sqrt(2 * 49))
    w1 = jax.random.normal(k1, (Cr, C), jnp.float32) * (1.0 / math.sqrt(C))    # fc[0].weight
    w2 = jax.random.normal(k2, (C, Cr), jnp.float32) * (1.0 / math.sqrt(Cr))   # fc[2].weight

    # Constant tables (DCT filters, masked 7x7 tap weights), built on host.
    mxi, myi = get_freq_indices("top16")
    mapper_x = [u * (dct_h // 7) for u in mxi]
    mapper_y = [v * (dct_w // 7) for v in myi]
    dct_flat_np = build_dct_filter(dct_h, dct_w, mapper_x, mapper_y, C)        # (C, HW)

    tb = pick_batch_block(B)                                                   # B on 1-TC, B//2 on v7x
    conv_w_np = np.asarray(conv_w)
    tap_w_np = build_spatial_tap_weights(conv_w_np, H, W, tb)                  # (49, 2*tb, HW)

    fwd = jax.jit(fcs_attention_forward)
    out = fwd(x, jnp.asarray(dct_flat_np), jnp.transpose(w1), w2,
              jnp.asarray(tap_w_np))
    out = jax.block_until_ready(out)

    assert out.shape == (B, C, H, W) and out.dtype == jnp.float32

    ref = reference_forward(np.asarray(x), dct_flat_np, np.asarray(w1),
                            np.asarray(w2), conv_w_np)
    err = float(np.max(np.abs(np.asarray(out) - ref)))
    assert err < 1e-2, f"max abs error vs reference too large: {err}"
    print("KERNEL_OK")
</pallas_src>

<mosaic_0001>
module attributes {stable_mosaic.version = 11 : i64} {
  func.func @kernel(%arg0: i32, %arg1: memref<2x64x256xf32, #tpu.memory_space<vmem>>, %arg2: memref<64x256xf32, #tpu.memory_space<vmem>>, %arg3: memref<64x4xf32, #tpu.memory_space<vmem>>, %arg4: memref<64x4xf32, #tpu.memory_space<vmem>>, %arg5: memref<49x4x256xf32, #tpu.memory_space<vmem>>, %arg6: memref<2x64x256xf32, #tpu.memory_space<vmem>>) attributes {dimension_semantics = [#tpu.dimension_semantics<parallel>], iteration_bounds = array<i64: 1>, scalar_prefetch = 0 : i64, scratch_operands = 0 : i64, tpu.core_type = #tpu.core_type<tc>, window_params = [{transform_indices = @transform_0, window_bounds = array<i64: 2, 64, 256>}, {pipeline_mode = #tpu.pipeline_mode<synchronous>, transform_indices = @transform_1, window_bounds = array<i64: 64, 256>}, {pipeline_mode = #tpu.pipeline_mode<synchronous>, transform_indices = @transform_2, window_bounds = array<i64: 64, 4>}, {pipeline_mode = #tpu.pipeline_mode<synchronous>, transform_indices = @transform_3, window_bounds = array<i64: 64, 4>}, {pipeline_mode = #tpu.pipeline_mode<synchronous>, transform_indices = @transform_4, window_bounds = array<i64: 49, 4, 256>}, {transform_indices = @transform_5, window_bounds = array<i64: 2, 64, 256>}]} {
    %c0 = arith.constant 0 : index
    %c0_0 = arith.constant 0 : index
    %0 = vector.load %arg2[%c0, %c0_0] : memref<64x256xf32, #tpu.memory_space<vmem>>, vector<64x256xf32>
    %c0_1 = arith.constant 0 : index
    %c0_2 = arith.constant 0 : index
    %1 = vector.load %arg3[%c0_1, %c0_2] : memref<64x4xf32, #tpu.memory_space<vmem>>, vector<64x4xf32>
    %c0_3 = arith.constant 0 : index
    %c0_4 = arith.constant 0 : index
    %2 = vector.load %arg4[%c0_3, %c0_4] : memref<64x4xf32, #tpu.memory_space<vmem>>, vector<64x4xf32>
    %c0_5 = arith.constant 0 : index
    %c0_6 = arith.constant 0 : index
    %c0_7 = arith.constant 0 : index
    %3 = vector.load %arg1[%c0_5, %c0_6, %c0_7] : memref<2x64x256xf32, #tpu.memory_space<vmem>>, vector<1x64x256xf32>
    %4 = vector.shape_cast %3 : vector<1x64x256xf32> to vector<64x256xf32>
    %5 = arith.mulf %4, %0 : vector<64x256xf32>
    %cst = arith.constant dense<0.000000e+00> : vector<64xf32>
    %6 = vector.multi_reduction <add>, %5, %cst [1] : vector<64x256xf32> to vector<64xf32>
    %7 = vector.shape_cast %6 : vector<64xf32> to vector<64x1xf32>
    %8 = vector.broadcast %7 : vector<64x1xf32> to vector<64x4xf32>
    %9 = arith.mulf %1, %8 : vector<64x4xf32>
    %cst_8 = arith.constant dense<0.000000e+00> : vector<4xf32>
    %10 = vector.multi_reduction <add>, %9, %cst_8 [0] : vector<64x4xf32> to vector<4xf32>
    %11 = vector.shape_cast %10 : vector<4xf32> to vector<1x4xf32>
    %cst_9 = arith.constant 0.000000e+00 : f32
    %12 = vector.broadcast %cst_9 : f32 to vector<1x4xf32>
    %13 = arith.maximumf %11, %12 : vector<1x4xf32>
    %14 = vector.broadcast %13 : vector<1x4xf32> to vector<64x4xf32>
    %15 = arith.mulf %2, %14 : vector<64x4xf32>
    %cst_10 = arith.constant dense<0.000000e+00> : vector<64xf32>
    %16 = vector.multi_reduction <add>, %15, %cst_10 [1] : vector<64x4xf32> to vector<64xf32>
    %17 = vector.shape_cast %16 : vector<64xf32> to vector<64x1xf32>
    %cst_11 = arith.constant 5.000000e-01 : f32
    %18 = vector.broadcast %cst_11 : f32 to vector<64x1xf32>
    %19 = arith.mulf %18, %17 : vector<64x1xf32>
    %20 = math.tanh %19 : vector<64x1xf32>
    %cst_12 = arith.constant 5.000000e-01 : f32
    %21 = vector.broadcast %cst_12 : f32 to vector<64x1xf32>
    %22 = arith.mulf %21, %20 : vector<64x1xf32>
    %cst_13 = arith.constant 5.000000e-01 : f32
    %23 = vector.broadcast %cst_13 : f32 to vector<64x1xf32>
    %24 = arith.addf %22, %23 : vector<64x1xf32>
    %25 = vector.broadcast %24 : vector<64x1xf32> to vector<64x256xf32>
    %26 = arith.mulf %4, %25 : vector<64x256xf32>
    %cst_14 = arith.constant dense<0.000000e+00> : vector<256xf32>
    %27 = vector.multi_reduction <add>, %26, %cst_14 [0] : vector<64x256xf32> to vector<256xf32>
    %28 = vector.shape_cast %27 : vector<256xf32> to vector<1x256xf32>
    %cst_15 = arith.constant 6.400000e+01 : f32
    %29 = vector.broadcast %cst_15 : f32 to vector<1x256xf32>
    %30 = arith.divf %28, %29 : vector<1x256xf32>
    %cst_16 = arith.constant dense<0xFF800000> : vector<256xf32>
    %31 = vector.multi_reduction <maximumf>, %26, %cst_16 [0] : vector<64x256xf32> to vector<256xf32>
    %32 = vector.shape_cast %31 : vector<256xf32> to vector<1x256xf32>
    %c1 = arith.constant 1 : index
    %c0_17 = arith.constant 0 : index
    %c0_18 = arith.constant 0 : index
    %33 = vector.load %arg1[%c1, %c0_17, %c0_18] : memref<2x64x256xf32, #tpu.memory_space<vmem>>, vector<1x64x256xf32>
    %34 = vector.shape_cast %33 : vector<1x64x256xf32> to vector<64x256xf32>
    %35 = arith.mulf %34, %0 : vector<64x256xf32>
    %cst_19 = arith.constant dense<0.000000e+00> : vector<64xf32>
    %36 = vector.multi_reduction <add>, %35, %cst_19 [1] : vector<64x256xf32> to vector<64xf32>
    %37 = vector.shape_cast %36 : vector<64xf32> to vector<64x1xf32>
    %38 = vector.broadcast %37 : vector<64x1xf32> to vector<64x4xf32>
    %39 = arith.mulf %1, %38 : vector<64x4xf32>
    %cst_20 = arith.constant dense<0.000000e+00> : vector<4xf32>
    %40 = vector.multi_reduction <add>, %39, %cst_20 [0] : vector<64x4xf32> to vector<4xf32>
    %41 = vector.shape_cast %40 : vector<4xf32> to vector<1x4xf32>
    %cst_21 = arith.constant 0.000000e+00 : f32
    %42 = vector.broadcast %cst_21 : f32 to vector<1x4xf32>
    %43 = arith.maximumf %41, %42 : vector<1x4xf32>
    %44 = vector.broadcast %43 : vector<1x4xf32> to vector<64x4xf32>
    %45 = arith.mulf %2, %44 : vector<64x4xf32>
    %cst_22 = arith.constant dense<0.000000e+00> : vector<64xf32>
    %46 = vector.multi_reduction <add>, %45, %cst_22 [1] : vector<64x4xf32> to vector<64xf32>
    %47 = vector.shape_cast %46 : vector<64xf32> to vector<64x1xf32>
    %cst_23 = arith.constant 5.000000e-01 : f32
    %48 = vector.broadcast %cst_23 : f32 to vector<64x1xf32>
    %49 = arith.mulf %48, %47 : vector<64x1xf32>
    %50 = math.tanh %49 : vector<64x1xf32>
    %cst_24 = arith.constant 5.000000e-01 : f32
    %51 = vector.broadcast %cst_24 : f32 to vector<64x1xf32>
    %52 = arith.mulf %51, %50 : vector<64x1xf32>
    %cst_25 = arith.constant 5.000000e-01 : f32
    %53 = vector.broadcast %cst_25 : f32 to vector<64x1xf32>
    %54 = arith.addf %52, %53 : vector<64x1xf32>
    %55 = vector.broadcast %54 : vector<64x1xf32> to vector<64x256xf32>
    %56 = arith.mulf %34, %55 : vector<64x256xf32>
    %cst_26 = arith.constant dense<0.000000e+00> : vector<256xf32>
    %57 = vector.multi_reduction <add>, %56, %cst_26 [0] : vector<64x256xf32> to vector<256xf32>
    %58 = vector.shape_cast %57 : vector<256xf32> to vector<1x256xf32>
    %cst_27 = arith.constant 6.400000e+01 : f32
    %59 = vector.broadcast %cst_27 : f32 to vector<1x256xf32>
    %60 = arith.divf %58, %59 : vector<1x256xf32>
    %cst_28 = arith.constant dense<0xFF800000> : vector<256xf32>
    %61 = vector.multi_reduction <maximumf>, %56, %cst_28 [0] : vector<64x256xf32> to vector<256xf32>
    %62 = vector.shape_cast %61 : vector<256xf32> to vector<1x256xf32>
    %63 = tpu.concatenate %30, %60, %32, %62 in 0 : vector<1x256xf32>, vector<1x256xf32>, vector<1x256xf32>, vector<1x256xf32> -> vector<4x256xf32>
    %cst_29 = arith.constant 0.000000e+00 : f32
    %64 = vector.broadcast %cst_29 : f32 to vector<4x256xf32>
    %cst_30 = arith.constant 0.000000e+00 : f32
    %65 = vector.broadcast %cst_30 : f32 to vector<4x256xf32>
    %cst_31 = arith.constant 0.000000e+00 : f32
    %66 = vector.broadcast %cst_31 : f32 to vector<4x256xf32>
    %cst_32 = arith.constant 0.000000e+00 : f32
    %67 = vector.broadcast %cst_32 : f32 to vector<4x256xf32>
    %c51_i32 = arith.constant 51 : i32
    %68 = tpu.dynamic_rotate %63 by %c51_i32 dim 1 : vector<4x256xf32>, i32 -> vector<4x256xf32>
    %c0_33 = arith.constant 0 : index
    %c0_34 = arith.constant 0 : index
    %c0_35 = arith.constant 0 : index
    %69 = vector.load %arg5[%c0_33, %c0_34, %c0_35] : memref<49x4x256xf32, #tpu.memory_space<vmem>>, vector<1x4x256xf32>
    %70 = vector.shape_cast %69 : vector<1x4x256xf32> to vector<4x256xf32>
    %71 = arith.mulf %68, %70 : vector<4x256xf32>
    %72 = arith.addf %64, %71 : vector<4x256xf32>
    %c50_i32 = arith.constant 50 : i32
    %73 = tpu.dynamic_rotate %63 by %c50_i32 dim 1 : vector<4x256xf32>, i32 -> vector<4x256xf32>
    %c1_36 = arith.constant 1 : index
    %c0_37 = arith.constant 0 : index
    %c0_38 = arith.constant 0 : index
    %74 = vector.load %arg5[%c1_36, %c0_37, %c0_38] : memref<49x4x256xf32, #tpu.memory_space<vmem>>, vector<1x4x256xf32>
    %75 = vector.shape_cast %74 : vector<1x4x256xf32> to vector<4x256xf32>
    %76 = arith.mulf %73, %75 : vector<4x256xf32>
    %77 = arith.addf %65, %76 : vector<4x256xf32>
    %c49_i32 = arith.constant 49 : i32
    %78 = tpu.dynamic_rotate %63 by %c49_i32 dim 1 : vector<4x256xf32>, i32 -> vector<4x256xf32>
    %c2 = arith.constant 2 : index
    %c0_39 = arith.constant 0 : index
    %c0_40 = arith.constant 0 : index
    %79 = vector.load %arg5[%c2, %c0_39, %c0_40] : memref<49x4x256xf32, #tpu.memory_space<vmem>>, vector<1x4x256xf32>
    %80 = vector.shape_cast %79 : vector<1x4x256xf32> to vector<4x256xf32>
    %81 = arith.mulf %78, %80 : vector<4x256xf32>
    %82 = arith.addf %66, %81 : vector<4x256xf32>
    %c48_i32 = arith.constant 48 : i32
    %83 = tpu.dynamic_rotate %63 by %c48_i32 dim 1 : vector<4x256xf32>, i32 -> vector<4x256xf32>
    %c3 = arith.constant 3 : index
    %c0_41 = arith.constant 0 : index
    %c0_42 = arith.constant 0 : index
    %84 = vector.load %arg5[%c3, %c0_41, %c0_42] : memref<49x4x256xf32, #tpu.memory_space<vmem>>, vector<1x4x256xf32>
    %85 = vector.shape_cast %84 : vector<1x4x256xf32> to vector<4x256xf32>
    %86 = arith.mulf %83, %85 : vector<4x256xf32>
    %87 = arith.addf %67, %86 : vector<4x256xf32>
    %c47_i32 = arith.constant 47 : i32
    %88 = tpu.dynamic_rotate %63 by %c47_i32 dim 1 : vector<4x256xf32>, i32 -> vector<4x256xf32>
    %c4 = arith.constant 4 : index
    %c0_43 = arith.constant 0 : index
    %c0_44 = arith.constant 0 : index
    %89 = vector.load %arg5[%c4, %c0_43, %c0_44] : memref<49x4x256xf32, #tpu.memory_space<vmem>>, vector<1x4x256xf32>
    %90 = vector.shape_cast %89 : vector<1x4x256xf32> to vector<4x256xf32>
    %91 = arith.mulf %88, %90 : vector<4x256xf32>
    %92 = arith.addf %72, %91 : vector<4x256xf32>
    %c46_i32 = arith.constant 46 : i32
    %93 = tpu.dynamic_rotate %63 by %c46_i32 dim 1 : vector<4x256xf32>, i32 -> vector<4x256xf32>
    %c5 = arith.constant 5 : index
    %c0_45 = arith.constant 0 : index
    %c0_46 = arith.constant 0 : index
    %94 = vector.load %arg5[%c5, %c0_45, %c0_46] : memref<49x4x256xf32, #tpu.memory_space<vmem>>, vector<1x4x256xf32>
    %95 = vector.shape_cast %94 : vector<1x4x256xf32> to vector<4x256xf32>
    %96 = arith.mulf %93, %95 : vector<4x256xf32>
    %97 = arith.addf %77, %96 : vector<4x256xf32>
    %c45_i32 = arith.constant 45 : i32
    %98 = tpu.dynamic_rotate %63 by %c45_i32 dim 1 : vector<4x256xf32>, i32 -> vector<4x256xf32>
    %c6 = arith.constant 6 : index
    %c0_47 = arith.constant 0 : index
    %c0_48 = arith.constant 0 : index
    %99 = vector.load %arg5[%c6, %c0_47, %c0_48] : memref<49x4x256xf32, #tpu.memory_space<vmem>>, vector<1x4x256xf32>
    %100 = vector.shape_cast %99 : vector<1x4x256xf32> to vector<4x256xf32>
    %101 = arith.mulf %98, %100 : vector<4x256xf32>
    %102 = arith.addf %82, %101 : vector<4x256xf32>
    %c35_i32 = arith.constant 35 : i32
    %103 = tpu.dynamic_rotate %63 by %c35_i32 dim 1 : vector<4x256xf32>, i32 -> vector<4x256xf32>
    %c7 = arith.constant 7 : index
    %c0_49 = arith.constant 0 : index
    %c0_50 = arith.constant 0 : index
    %104 = vector.load %arg5[%c7, %c0_49, %c0_50] : memref<49x4x256xf32, #tpu.memory_space<vmem>>, vector<1x4x256xf32>
    %105 = vector.shape_cast %104 : vector<1x4x256xf32> to vector<4x256xf32>
    %106 = arith.mulf %103, %105 : vector<4x256xf32>
    %107 = arith.addf %87, %106 : vector<4x256xf32>
    %c34_i32 = arith.constant 34 : i32
    %108 = tpu.dynamic_rotate %63 by %c34_i32 dim 1 : vector<4x256xf32>, i32 -> vector<4x256xf32>
    %c8 = arith.constant 8 : index
    %c0_51 = arith.constant 0 : index
    %c0_52 = arith.constant 0 : index
    %109 = vector.load %arg5[%c8, %c0_51, %c0_52] : memref<49x4x256xf32, #tpu.memory_space<vmem>>, vector<1x4x256xf32>
    %110 = vector.shape_cast %109 : vector<1x4x256xf32> to vector<4x256xf32>
    %111 = arith.mulf %108, %110 : vector<4x256xf32>
    %112 = arith.addf %92, %111 : vector<4x256xf32>
    %c33_i32 = arith.constant 33 : i32
    %113 = tpu.dynamic_rotate %63 by %c33_i32 dim 1 : vector<4x256xf32>, i32 -> vector<4x256xf32>
    %c9 = arith.constant 9 : index
    %c0_53 = arith.constant 0 : index
    %c0_54 = arith.constant 0 : index
    %114 = vector.load %arg5[%c9, %c0_53, %c0_54] : memref<49x4x256xf32, #tpu.memory_space<vmem>>, vector<1x4x256xf32>
    %115 = vector.shape_cast %114 : vector<1x4x256xf32> to vector<4x256xf32>
    %116 = arith.mulf %113, %115 : vector<4x256xf32>
    %117 = arith.addf %97, %116 : vector<4x256xf32>
    %c32_i32 = arith.constant 32 : i32
    %118 = tpu.dynamic_rotate %63 by %c32_i32 dim 1 : vector<4x256xf32>, i32 -> vector<4x256xf32>
    %c10 = arith.constant 10 : index
    %c0_55 = arith.constant 0 : index
    %c0_56 = arith.constant 0 : index
    %119 = vector.load %arg5[%c10, %c0_55, %c0_56] : memref<49x4x256xf32, #tpu.memory_space<vmem>>, vector<1x4x256xf32>
    %120 = vector.shape_cast %119 : vector<1x4x256xf32> to vector<4x256xf32>
    %121 = arith.mulf %118, %120 : vector<4x256xf32>
    %122 = arith.addf %102, %121 : vector<4x256xf32>
    %c31_i32 = arith.constant 31 : i32
    %123 = tpu.dynamic_rotate %63 by %c31_i32 dim 1 : vector<4x256xf32>, i32 -> vector<4x256xf32>
    %c11 = arith.constant 11 : index
    %c0_57 = arith.constant 0 : index
    %c0_58 = arith.constant 0 : index
    %124 = vector.load %arg5[%c11, %c0_57, %c0_58] : memref<49x4x256xf32, #tpu.memory_space<vmem>>, vector<1x4x256xf32>
    %125 = vector.shape_cast %124 : vector<1x4x256xf32> to vector<4x256xf32>
    %126 = arith.mulf %123, %125 : vector<4x256xf32>
    %127 = arith.addf %107, %126 : vector<4x256xf32>
    %c30_i32 = arith.constant 30 : i32
    %128 = tpu.dynamic_rotate %63 by %c30_i32 dim 1 : vector<4x256xf32>, i32 -> vector<4x256xf32>
    %c12 = arith.constant 12 : index
    %c0_59 = arith.constant 0 : index
    %c0_60 = arith.constant 0 : index
    %129 = vector.load %arg5[%c12, %c0_59, %c0_60] : memref<49x4x256xf32, #tpu.memory_space<vmem>>, vector<1x4x256xf32>
    %130 = vector.shape_cast %129 : vector<1x4x256xf32> to vector<4x256xf32>
    %131 = arith.mulf %128, %130 : vector<4x256xf32>
    %132 = arith.addf %112, %131 : vector<4x256xf32>
    %c29_i32 = arith.constant 29 : i32
    %133 = tpu.dynamic_rotate %63 by %c29_i32 dim 1 : vector<4x256xf32>, i32 -> vector<4x256xf32>
    %c13 = arith.constant 13 : index
    %c0_61 = arith.constant 0 : index
    %c0_62 = arith.constant 0 : index
    %134 = vector.load %arg5[%c13, %c0_61, %c0_62] : memref<49x4x256xf32, #tpu.memory_space<vmem>>, vector<1x4x256xf32>
    %135 = vector.shape_cast %134 : vector<1x4x256xf32> to vector<4x256xf32>
    %136 = arith.mulf %133, %135 : vector<4x256xf32>
    %137 = arith.addf %117, %136 : vector<4x256xf32>
    %c19_i32 = arith.constant 19 : i32
    %138 = tpu.dynamic_rotate %63 by %c19_i32 dim 1 : vector<4x256xf32>, i32 -> vector<4x256xf32>
    %c14 = arith.constant 14 : index
    %c0_63 = arith.constant 0 : index
    %c0_64 = arith.constant 0 : index
    %139 = vector.load %arg5[%c14, %c0_63, %c0_64] : memref<49x4x256xf32, #tpu.memory_space<vmem>>, vector<1x4x256xf32>
    %140 = vector.shape_cast %139 : vector<1x4x256xf32> to vector<4x256xf32>
    %141 = arith.mulf %138, %140 : vector<4x256xf32>
    %142 = arith.addf %122, %141 : vector<4x256xf32>
    %c18_i32 = arith.constant 18 : i32
    %143 = tpu.dynamic_rotate %63 by %c18_i32 dim 1 : vector<4x256xf32>, i32 -> vector<4x256xf32>
    %c15 = arith.constant 15 : index
    %c0_65 = arith.constant 0 : index
    %c0_66 = arith.constant 0 : index
    %144 = vector.load %arg5[%c15, %c0_65, %c0_66] : memref<49x4x256xf32, #tpu.memory_space<vmem>>, vector<1x4x256xf32>
    %145 = vector.shape_cast %144 : vector<1x4x256xf32> to vector<4x256xf32>
    %146 = arith.mulf %143, %145 : vector<4x256xf32>
    %147 = arith.addf %127, %146 : vector<4x256xf32>
    %c17_i32 = arith.constant 17 : i32
    %148 = tpu.dynamic_rotate %63 by %c17_i32 dim 1 : vector<4x256xf32>, i32 -> vector<4x256xf32>
    %c16 = arith.constant 16 : index
    %c0_67 = arith.constant 0 : index
    %c0_68 = arith.constant 0 : index
    %149 = vector.load %arg5[%c16, %c0_67, %c0_68] : memref<49x4x256xf32, #tpu.memory_space<vmem>>, vector<1x4x256xf32>
    %150 = vector.shape_cast %149 : vector<1x4x256xf32> to vector<4x256xf32>
    %151 = arith.mulf %148, %150 : vector<4x256xf32>
    %152 = arith.addf %132, %151 : vector<4x256xf32>
    %c16_i32 = arith.constant 16 : i32
    %153 = tpu.dynamic_rotate %63 by %c16_i32 dim 1 : vector<4x256xf32>, i32 -> vector<4x256xf32>
    %c17 = arith.constant 17 : index
    %c0_69 = arith.constant 0 : index
    %c0_70 = arith.constant 0 : index
    %154 = vector.load %arg5[%c17, %c0_69, %c0_70] : memref<49x4x256xf32, #tpu.memory_space<vmem>>, vector<1x4x256xf32>
    %155 = vector.shape_cast %154 : vector<1x4x256xf32> to vector<4x256xf32>
    %156 = arith.mulf %153, %155 : vector<4x256xf32>
    %157 = arith.addf %137, %156 : vector<4x256xf32>
    %c15_i32 = arith.constant 15 : i32
    %158 = tpu.dynamic_rotate %63 by %c15_i32 dim 1 : vector<4x256xf32>, i32 -> vector<4x256xf32>
    %c18 = arith.constant 18 : index
    %c0_71 = arith.constant 0 : index
    %c0_72 = arith.constant 0 : index
    %159 = vector.load %arg5[%c18, %c0_71, %c0_72] : memref<49x4x256xf32, #tpu.memory_space<vmem>>, vector<1x4x256xf32>
    %160 = vector.shape_cast %159 : vector<1x4x256xf32> to vector<4x256xf32>
    %161 = arith.mulf %158, %160 : vector<4x256xf32>
    %162 = arith.addf %142, %161 : vector<4x256xf32>
    %c14_i32 = arith.constant 14 : i32
    %163 = tpu.dynamic_rotate %63 by %c14_i32 dim 1 : vector<4x256xf32>, i32 -> vector<4x256xf32>
    %c19 = arith.constant 19 : index
    %c0_73 = arith.constant 0 : index
    %c0_74 = arith.constant 0 : index
    %164 = vector.load %arg5[%c19, %c0_73, %c0_74] : memref<49x4x256xf32, #tpu.memory_space<vmem>>, vector<1x4x256xf32>
    %165 = vector.shape_cast %164 : vector<1x4x256xf32> to vector<4x256xf32>
    %166 = arith.mulf %163, %165 : vector<4x256xf32>
    %167 = arith.addf %147, %166 : vector<4x256xf32>
    %c13_i32 = arith.constant 13 : i32
    %168 = tpu.dynamic_rotate %63 by %c13_i32 dim 1 : vector<4x256xf32>, i32 -> vector<4x256xf32>
    %c20 = arith.constant 20 : index
    %c0_75 = arith.constant 0 : index
    %c0_76 = arith.constant 0 : index
    %169 = vector.load %arg5[%c20, %c0_75, %c0_76] : memref<49x4x256xf32, #tpu.memory_space<vmem>>, vector<1x4x256xf32>
    %170 = vector.shape_cast %169 : vector<1x4x256xf32> to vector<4x256xf32>
    %171 = arith.mulf %168, %170 : vector<4x256xf32>
    %172 = arith.addf %152, %171 : vector<4x256xf32>
    %c3_i32 = arith.constant 3 : i32
    %173 = tpu.dynamic_rotate %63 by %c3_i32 dim 1 : vector<4x256xf32>, i32 -> vector<4x256xf32>
    %c21 = arith.constant 21 : index
    %c0_77 = arith.constant 0 : index
    %c0_78 = arith.constant 0 : index
    %174 = vector.load %arg5[%c21, %c0_77, %c0_78] : memref<49x4x256xf32, #tpu.memory_space<vmem>>, vector<1x4x256xf32>
    %175 = vector.shape_cast %174 : vector<1x4x256xf32> to vector<4x256xf32>
    %176 = arith.mulf %173, %175 : vector<4x256xf32>
    %177 = arith.addf %157, %176 : vector<4x256xf32>
    %c2_i32 = arith.constant 2 : i32
    %178 = tpu.dynamic_rotate %63 by %c2_i32 dim 1 : vector<4x256xf32>, i32 -> vector<4x256xf32>
    %c22 = arith.constant 22 : index
    %c0_79 = arith.constant 0 : index
    %c0_80 = arith.constant 0 : index
    %179 = vector.load %arg5[%c22, %c0_79, %c0_80] : memref<49x4x256xf32, #tpu.memory_space<vmem>>, vector<1x4x256xf32>
    %180 = vector.shape_cast %179 : vector<1x4x256xf32> to vector<4x256xf32>
    %181 = arith.mulf %178, %180 : vector<4x256xf32>
    %182 = arith.addf %162, %181 : vector<4x256xf32>
    %c1_i32 = arith.constant 1 : i32
    %183 = tpu.dynamic_rotate %63 by %c1_i32 dim 1 : vector<4x256xf32>, i32 -> vector<4x256xf32>
    %c23 = arith.constant 23 : index
    %c0_81 = arith.constant 0 : index
    %c0_82 = arith.constant 0 : index
    %184 = vector.load %arg5[%c23, %c0_81, %c0_82] : memref<49x4x256xf32, #tpu.memory_space<vmem>>, vector<1x4x256xf32>
    %185 = vector.shape_cast %184 : vector<1x4x256xf32> to vector<4x256xf32>
    %186 = arith.mulf %183, %185 : vector<4x256xf32>
    %187 = arith.addf %167, %186 : vector<4x256xf32>
    %c24 = arith.constant 24 : index
    %c0_83 = arith.constant 0 : index
    %c0_84 = arith.constant 0 : index
    %188 = vector.load %arg5[%c24, %c0_83, %c0_84] : memref<49x4x256xf32, #tpu.memory_space<vmem>>, vector<1x4x256xf32>
    %189 = vector.shape_cast %188 : vector<1x4x256xf32> to vector<4x256xf32>
    %190 = arith.mulf %63, %189 : vector<4x256xf32>
    %191 = arith.addf %172, %190 : vector<4x256xf32>
    %c255_i32 = arith.constant 255 : i32
    %192 = tpu.dynamic_rotate %63 by %c255_i32 dim 1 : vector<4x256xf32>, i32 -> vector<4x256xf32>
    %c25 = arith.constant 25 : index
    %c0_85 = arith.constant 0 : index
    %c0_86 = arith.constant 0 : index
    %193 = vector.load %arg5[%c25, %c0_85, %c0_86] : memref<49x4x256xf32, #tpu.memory_space<vmem>>, vector<1x4x256xf32>
    %194 = vector.shape_cast %193 : vector<1x4x256xf32> to vector<4x256xf32>
    %195 = arith.mulf %192, %194 : vector<4x256xf32>
    %196 = arith.addf %177, %195 : vector<4x256xf32>
    %c254_i32 = arith.constant 254 : i32
    %197 = tpu.dynamic_rotate %63 by %c254_i32 dim 1 : vector<4x256xf32>, i32 -> vector<4x256xf32>
    %c26 = arith.constant 26 : index
    %c0_87 = arith.constant 0 : index
    %c0_88 = arith.constant 0 : index
    %198 = vector.load %arg5[%c26, %c0_87, %c0_88] : memref<49x4x256xf32, #tpu.memory_space<vmem>>, vector<1x4x256xf32>
    %199 = vector.shape_cast %198 : vector<1x4x256xf32> to vector<4x256xf32>
    %200 = arith.mulf %197, %199 : vector<4x256xf32>
    %201 = arith.addf %182, %200 : vector<4x256xf32>
    %c253_i32 = arith.constant 253 : i32
    %202 = tpu.dynamic_rotate %63 by %c253_i32 dim 1 : vector<4x256xf32>, i32 -> vector<4x256xf32>
    %c27 = arith.constant 27 : index
    %c0_89 = arith.constant 0 : index
    %c0_90 = arith.constant 0 : index
    %203 = vector.load %arg5[%c27, %c0_89, %c0_90] : memref<49x4x256xf32, #tpu.memory_space<vmem>>, vector<1x4x256xf32>
    %204 = vector.shape_cast %203 : vector<1x4x256xf32> to vector<4x256xf32>
    %205 = arith.mulf %202, %204 : vector<4x256xf32>
    %206 = arith.addf %187, %205 : vector<4x256xf32>
    %c243_i32 = arith.constant 243 : i32
    %207 = tpu.dynamic_rotate %63 by %c243_i32 dim 1 : vector<4x256xf32>, i32 -> vector<4x256xf32>
    %c28 = arith.constant 28 : index
    %c0_91 = arith.constant 0 : index
    %c0_92 = arith.constant 0 : index
    %208 = vector.load %arg5[%c28, %c0_91, %c0_92] : memref<49x4x256xf32, #tpu.memory_space<vmem>>, vector<1x4x256xf32>
    %209 = vector.shape_cast %208 : vector<1x4x256xf32> to vector<4x256xf32>
    %210 = arith.mulf %207, %209 : vector<4x256xf32>
    %211 = arith.addf %191, %210 : vector<4x256xf32>
    %c242_i32 = arith.constant 242 : i32
    %212 = tpu.dynamic_rotate %63 by %c242_i32 dim 1 : vector<4x256xf32>, i32 -> vector<4x256xf32>
    %c29 = arith.constant 29 : index
    %c0_93 = arith.constant 0 : index
    %c0_94 = arith.constant 0 : index
    %213 = vector.load %arg5[%c29, %c0_93, %c0_94] : memref<49x4x256xf32, #tpu.memory_space<vmem>>, vector<1x4x256xf32>
    %214 = vector.shape_cast %213 : vector<1x4x256xf32> to vector<4x256xf32>
    %215 = arith.mulf %212, %214 : vector<4x256xf32>
    %216 = arith.addf %196, %215 : vector<4x256xf32>
    %c241_i32 = arith.constant 241 : i32
    %217 = tpu.dynamic_rotate %63 by %c241_i32 dim 1 : vector<4x256xf32>, i32 -> vector<4x256xf32>
    %c30 = arith.constant 30 : index
    %c0_95 = arith.constant 0 : index
    %c0_96 = arith.constant 0 : index
    %218 = vector.load %arg5[%c30, %c0_95, %c0_96] : memref<49x4x256xf32, #tpu.memory_space<vmem>>, vector<1x4x256xf32>
    %219 = vector.shape_cast %218 : vector<1x4x256xf32> to vector<4x256xf32>
    %220 = arith.mulf %217, %219 : vector<4x256xf32>
    %221 = arith.addf %201, %220 : vector<4x256xf32>
    %c240_i32 = arith.constant 240 : i32
    %222 = tpu.dynamic_rotate %63 by %c240_i32 dim 1 : vector<4x256xf32>, i32 -> vector<4x256xf32>
    %c31 = arith.constant 31 : index
    %c0_97 = arith.constant 0 : index
    %c0_98 = arith.constant 0 : index
    %223 = vector.load %arg5[%c31, %c0_97, %c0_98] : memref<49x4x256xf32, #tpu.memory_space<vmem>>, vector<1x4x256xf32>
    %224 = vector.shape_cast %223 : vector<1x4x256xf32> to vector<4x256xf32>
    %225 = arith.mulf %222, %224 : vector<4x256xf32>
    %226 = arith.addf %206, %225 : vector<4x256xf32>
    %c239_i32 = arith.constant 239 : i32
    %227 = tpu.dynamic_rotate %63 by %c239_i32 dim 1 : vector<4x256xf32>, i32 -> vector<4x256xf32>
    %c32 = arith.constant 32 : index
    %c0_99 = arith.constant 0 : index
    %c0_100 = arith.constant 0 : index
    %228 = vector.load %arg5[%c32, %c0_99, %c0_100] : memref<49x4x256xf32, #tpu.memory_space<vmem>>, vector<1x4x256xf32>
    %229 = vector.shape_cast %228 : vector<1x4x256xf32> to vector<4x256xf32>
    %230 = arith.mulf %227, %229 : vector<4x256xf32>
    %231 = arith.addf %211, %230 : vector<4x256xf32>
    %c238_i32 = arith.constant 238 : i32
    %232 = tpu.dynamic_rotate %63 by %c238_i32 dim 1 : vector<4x256xf32>, i32 -> vector<4x256xf32>
    %c33 = arith.constant 33 : index
    %c0_101 = arith.constant 0 : index
    %c0_102 = arith.constant 0 : index
    %233 = vector.load %arg5[%c33, %c0_101, %c0_102] : memref<49x4x256xf32, #tpu.memory_space<vmem>>, vector<1x4x256xf32>
    %234 = vector.shape_cast %233 : vector<1x4x256xf32> to vector<4x256xf32>
    %235 = arith.mulf %232, %234 : vector<4x256xf32>
    %236 = arith.addf %216, %235 : vector<4x256xf32>
    %c237_i32 = arith.constant 237 : i32
    %237 = tpu.dynamic_rotate %63 by %c237_i32 dim 1 : vector<4x256xf32>, i32 -> vector<4x256xf32>
    %c34 = arith.constant 34 : index
    %c0_103 = arith.constant 0 : index
    %c0_104 = arith.constant 0 : index
    %238 = vector.load %arg5[%c34, %c0_103, %c0_104] : memref<49x4x256xf32, #tpu.memory_space<vmem>>, vector<1x4x256xf32>
    %239 = vector.shape_cast %238 : vector<1x4x256xf32> to vector<4x256xf32>
    %240 = arith.mulf %237, %239 : vector<4x256xf32>
    %241 = arith.addf %221, %240 : vector<4x256xf32>
    %c227_i32 = arith.constant 227 : i32
    %242 = tpu.dynamic_rotate %63 by %c227_i32 dim 1 : vector<4x256xf32>, i32 -> vector<4x256xf32>
    %c35 = arith.constant 35 : index
    %c0_105 = arith.constant 0 : index
    %c0_106 = arith.constant 0 : index
    %243 = vector.load %arg5[%c35, %c0_105, %c0_106] : memref<49x4x256xf32, #tpu.memory_space<vmem>>, vector<1x4x256xf32>
    %244 = vector.shape_cast %243 : vector<1x4x256xf32> to vector<4x256xf32>
    %245 = arith.mulf %242, %244 : vector<4x256xf32>
    %246 = arith.addf %226, %245 : vector<4x256xf32>
    %c226_i32 = arith.constant 226 : i32
    %247 = tpu.dynamic_rotate %63 by %c226_i32 dim 1 : vector<4x256xf32>, i32 -> vector<4x256xf32>
    %c36 = arith.constant 36 : index
    %c0_107 = arith.constant 0 : index
    %c0_108 = arith.constant 0 : index
    %248 = vector.load %arg5[%c36, %c0_107, %c0_108] : memref<49x4x256xf32, #tpu.memory_space<vmem>>, vector<1x4x256xf32>
    %249 = vector.shape_cast %248 : vector<1x4x256xf32> to vector<4x256xf32>
    %250 = arith.mulf %247, %249 : vector<4x256xf32>
    %251 = arith.addf %231, %250 : vector<4x256xf32>
    %c225_i32 = arith.constant 225 : i32
    %252 = tpu.dynamic_rotate %63 by %c225_i32 dim 1 : vector<4x256xf32>, i32 -> vector<4x256xf32>
    %c37 = arith.constant 37 : index
    %c0_109 = arith.constant 0 : index
    %c0_110 = arith.constant 0 : index
    %253 = vector.load %arg5[%c37, %c0_109, %c0_110] : memref<49x4x256xf32, #tpu.memory_space<vmem>>, vector<1x4x256xf32>
    %254 = vector.shape_cast %253 : vector<1x4x256xf32> to vector<4x256xf32>
    %255 = arith.mulf %252, %254 : vector<4x256xf32>
    %256 = arith.addf %236, %255 : vector<4x256xf32>
    %c224_i32 = arith.constant 224 : i32
    %257 = tpu.dynamic_rotate %63 by %c224_i32 dim 1 : vector<4x256xf32>, i32 -> vector<4x256xf32>
    %c38 = arith.constant 38 : index
    %c0_111 = arith.constant 0 : index
    %c0_112 = arith.constant 0 : index
    %258 = vector.load %arg5[%c38, %c0_111, %c0_112] : memref<49x4x256xf32, #tpu.memory_space<vmem>>, vector<1x4x256xf32>
    %259 = vector.shape_cast %258 : vector<1x4x256xf32> to vector<4x256xf32>
    %260 = arith.mulf %257, %259 : vector<4x256xf32>
    %261 = arith.addf %241, %260 : vector<4x256xf32>
    %c223_i32 = arith.constant 223 : i32
    %262 = tpu.dynamic_rotate %63 by %c223_i32 dim 1 : vector<4x256xf32>, i32 -> vector<4x256xf32>
    %c39 = arith.constant 39 : index
    %c0_113 = arith.constant 0 : index
    %c0_114 = arith.constant 0 : index
    %263 = vector.load %arg5[%c39, %c0_113, %c0_114] : memref<49x4x256xf32, #tpu.memory_space<vmem>>, vector<1x4x256xf32>
    %264 = vector.shape_cast %263 : vector<1x4x256xf32> to vector<4x256xf32>
    %265 = arith.mulf %262, %264 : vector<4x256xf32>
    %266 = arith.addf %246, %265 : vector<4x256xf32>
    %c222_i32 = arith.constant 222 : i32
    %267 = tpu.dynamic_rotate %63 by %c222_i32 dim 1 : vector<4x256xf32>, i32 -> vector<4x256xf32>
    %c40 = arith.constant 40 : index
    %c0_115 = arith.constant 0 : index
    %c0_116 = arith.constant 0 : index
    %268 = vector.load %arg5[%c40, %c0_115, %c0_116] : memref<49x4x256xf32, #tpu.memory_space<vmem>>, vector<1x4x256xf32>
    %269 = vector.shape_cast %268 : vector<1x4x256xf32> to vector<4x256xf32>
    %270 = arith.mulf %267, %269 : vector<4x256xf32>
    %271 = arith.addf %251, %270 : vector<4x256xf32>
    %c221_i32 = arith.constant 221 : i32
    %272 = tpu.dynamic_rotate %63 by %c221_i32 dim 1 : vector<4x256xf32>, i32 -> vector<4x256xf32>
    %c41 = arith.constant 41 : index
    %c0_117 = arith.constant 0 : index
    %c0_118 = arith.constant 0 : index
    %273 = vector.load %arg5[%c41, %c0_117, %c0_118] : memref<49x4x256xf32, #tpu.memory_space<vmem>>, vector<1x4x256xf32>
    %274 = vector.shape_cast %273 : vector<1x4x256xf32> to vector<4x256xf32>
    %275 = arith.mulf %272, %274 : vector<4x256xf32>
    %276 = arith.addf %256, %275 : vector<4x256xf32>
    %c211_i32 = arith.constant 211 : i32
    %277 = tpu.dynamic_rotate %63 by %c211_i32 dim 1 : vector<4x256xf32>, i32 -> vector<4x256xf32>
    %c42 = arith.constant 42 : index
    %c0_119 = arith.constant 0 : index
    %c0_120 = arith.constant 0 : index
    %278 = vector.load %arg5[%c42, %c0_119, %c0_120] : memref<49x4x256xf32, #tpu.memory_space<vmem>>, vector<1x4x256xf32>
    %279 = vector.shape_cast %278 : vector<1x4x256xf32> to vector<4x256xf32>
    %280 = arith.mulf %277, %279 : vector<4x256xf32>
    %281 = arith.addf %261, %280 : vector<4x256xf32>
    %c210_i32 = arith.constant 210 : i32
    %282 = tpu.dynamic_rotate %63 by %c210_i32 dim 1 : vector<4x256xf32>, i32 -> vector<4x256xf32>
    %c43 = arith.constant 43 : index
    %c0_121 = arith.constant 0 : index
    %c0_122 = arith.constant 0 : index
    %283 = vector.load %arg5[%c43, %c0_121, %c0_122] : memref<49x4x256xf32, #tpu.memory_space<vmem>>, vector<1x4x256xf32>
    %284 = vector.shape_cast %283 : vector<1x4x256xf32> to vector<4x256xf32>
    %285 = arith.mulf %282, %284 : vector<4x256xf32>
    %286 = arith.addf %266, %285 : vector<4x256xf32>
    %c209_i32 = arith.constant 209 : i32
    %287 = tpu.dynamic_rotate %63 by %c209_i32 dim 1 : vector<4x256xf32>, i32 -> vector<4x256xf32>
    %c44 = arith.constant 44 : index
    %c0_123 = arith.constant 0 : index
    %c0_124 = arith.constant 0 : index
    %288 = vector.load %arg5[%c44, %c0_123, %c0_124] : memref<49x4x256xf32, #tpu.memory_space<vmem>>, vector<1x4x256xf32>
    %289 = vector.shape_cast %288 : vector<1x4x256xf32> to vector<4x256xf32>
    %290 = arith.mulf %287, %289 : vector<4x256xf32>
    %291 = arith.addf %271, %290 : vector<4x256xf32>
    %c208_i32 = arith.constant 208 : i32
    %292 = tpu.dynamic_rotate %63 by %c208_i32 dim 1 : vector<4x256xf32>, i32 -> vector<4x256xf32>
    %c45 = arith.constant 45 : index
    %c0_125 = arith.constant 0 : index
    %c0_126 = arith.constant 0 : index
    %293 = vector.load %arg5[%c45, %c0_125, %c0_126] : memref<49x4x256xf32, #tpu.memory_space<vmem>>, vector<1x4x256xf32>
    %294 = vector.shape_cast %293 : vector<1x4x256xf32> to vector<4x256xf32>
    %295 = arith.mulf %292, %294 : vector<4x256xf32>
    %296 = arith.addf %276, %295 : vector<4x256xf32>
    %c207_i32 = arith.constant 207 : i32
    %297 = tpu.dynamic_rotate %63 by %c207_i32 dim 1 : vector<4x256xf32>, i32 -> vector<4x256xf32>
    %c46 = arith.constant 46 : index
    %c0_127 = arith.constant 0 : index
    %c0_128 = arith.constant 0 : index
    %298 = vector.load %arg5[%c46, %c0_127, %c0_128] : memref<49x4x256xf32, #tpu.memory_space<vmem>>, vector<1x4x256xf32>
    %299 = vector.shape_cast %298 : vector<1x4x256xf32> to vector<4x256xf32>
    %300 = arith.mulf %297, %299 : vector<4x256xf32>
    %301 = arith.addf %281, %300 : vector<4x256xf32>
    %c206_i32 = arith.constant 206 : i32
    %302 = tpu.dynamic_rotate %63 by %c206_i32 dim 1 : vector<4x256xf32>, i32 -> vector<4x256xf32>
    %c47 = arith.constant 47 : index
    %c0_129 = arith.constant 0 : index
    %c0_130 = arith.constant 0 : index
    %303 = vector.load %arg5[%c47, %c0_129, %c0_130] : memref<49x4x256xf32, #tpu.memory_space<vmem>>, vector<1x4x256xf32>
    %304 = vector.shape_cast %303 : vector<1x4x256xf32> to vector<4x256xf32>
    %305 = arith.mulf %302, %304 : vector<4x256xf32>
    %306 = arith.addf %286, %305 : vector<4x256xf32>
    %c205_i32 = arith.constant 205 : i32
    %307 = tpu.dynamic_rotate %63 by %c205_i32 dim 1 : vector<4x256xf32>, i32 -> vector<4x256xf32>
    %c48 = arith.constant 48 : index
    %c0_131 = arith.constant 0 : index
    %c0_132 = arith.constant 0 : index
    %308 = vector.load %arg5[%c48, %c0_131, %c0_132] : memref<49x4x256xf32, #tpu.memory_space<vmem>>, vector<1x4x256xf32>
    %309 = vector.shape_cast %308 : vector<1x4x256xf32> to vector<4x256xf32>
    %310 = arith.mulf %307, %309 : vector<4x256xf32>
    %311 = arith.addf %291, %310 : vector<4x256xf32>
    %312 = arith.addf %311, %296 : vector<4x256xf32>
    %313 = arith.addf %301, %306 : vector<4x256xf32>
    %314 = arith.addf %312, %313 : vector<4x256xf32>
    %315 = vector.extract_strided_slice %314 {offsets = [0, 0], sizes = [2, 256], strides = [1, 1]} : vector<4x256xf32> to vector<2x256xf32>
    %316 = vector.extract_strided_slice %314 {offsets = [2, 0], sizes = [2, 256], strides = [1, 1]} : vector<4x256xf32> to vector<2x256xf32>
    %317 = arith.addf %315, %316 : vector<2x256xf32>
    %cst_133 = arith.constant 5.000000e-01 : f32
    %318 = vector.broadcast %cst_133 : f32 to vector<2x256xf32>
    %319 = arith.mulf %318, %317 : vector<2x256xf32>
    %320 = math.tanh %319 : vector<2x256xf32>
    %cst_134 = arith.constant 5.000000e-01 : f32
    %321 = vector.broadcast %cst_134 : f32 to vector<2x256xf32>
    %322 = arith.mulf %321, %320 : vector<2x256xf32>
    %cst_135 = arith.constant 5.000000e-01 : f32
    %323 = vector.broadcast %cst_135 : f32 to vector<2x256xf32>
    %324 = arith.addf %322, %323 : vector<2x256xf32>
    %325 = vector.extract_strided_slice %324 {offsets = [0, 0], sizes = [1, 256], strides = [1, 1]} : vector<2x256xf32> to vector<1x256xf32>
    %326 = vector.broadcast %325 : vector<1x256xf32> to vector<64x256xf32>
    %327 = arith.mulf %26, %326 : vector<64x256xf32>
    %c0_136 = arith.constant 0 : index
    %c0_137 = arith.constant 0 : index
    %c0_138 = arith.constant 0 : index
    %328 = vector.load %arg6[%c0_136, %c0_137, %c0_138] : memref<2x64x256xf32, #tpu.memory_space<vmem>>, vector<1x64x256xf32>
    %329 = vector.shape_cast %328 : vector<1x64x256xf32> to vector<64x256xf32>
    %330 = vector.shape_cast %327 : vector<64x256xf32> to vector<1x64x256xf32>
    tpu.vector_store %arg6[%c0_136, %c0_137, %c0_138], %330 {strides = array<i32>} : memref<2x64x256xf32, #tpu.memory_space<vmem>>, vector<1x64x256xf32>,
    %331 = vector.extract_strided_slice %324 {offsets = [1, 0], sizes = [1, 256], strides = [1, 1]} : vector<2x256xf32> to vector<1x256xf32>
    %332 = vector.broadcast %331 : vector<1x256xf32> to vector<64x256xf32>
    %333 = arith.mulf %56, %332 : vector<64x256xf32>
    %c1_139 = arith.constant 1 : index
    %c0_140 = arith.constant 0 : index
    %c0_141 = arith.constant 0 : index
    %334 = vector.load %arg6[%c1_139, %c0_140, %c0_141] : memref<2x64x256xf32, #tpu.memory_space<vmem>>, vector<1x64x256xf32>
    %335 = vector.shape_cast %334 : vector<1x64x256xf32> to vector<64x256xf32>
    %336 = vector.shape_cast %333 : vector<64x256xf32> to vector<1x64x256xf32>
    tpu.vector_store %arg6[%c1_139, %c0_140, %c0_141], %336 {strides = array<i32>} : memref<2x64x256xf32, #tpu.memory_space<vmem>>, vector<1x64x256xf32>,
    return
  }
  func.func @transform_0(%arg0: i32) -> (i32, i32, i32) {
    %c0_i32 = arith.constant 0 : i32
    %c0_i32_0 = arith.constant 0 : i32
    %c0_i32_1 = arith.constant 0 : i32
    return %arg0, %c0_i32, %c0_i32_0 : i32, i32, i32
  }
  func.func @transform_1(%arg0: i32) -> (i32, i32) {
    %c0_i32 = arith.constant 0 : i32
    %c0_i32_0 = arith.constant 0 : i32
    %c0_i32_1 = arith.constant 0 : i32
    return %c0_i32, %c0_i32_0 : i32, i32
  }
  func.func @transform_2(%arg0: i32) -> (i32, i32) {
    %c0_i32 = arith.constant 0 : i32
    %c0_i32_0 = arith.constant 0 : i32
    %c0_i32_1 = arith.constant 0 : i32
    return %c0_i32, %c0_i32_0 : i32, i32
  }
  func.func @transform_3(%arg0: i32) -> (i32, i32) {
    %c0_i32 = arith.constant 0 : i32
    %c0_i32_0 = arith.constant 0 : i32
    %c0_i32_1 = arith.constant 0 : i32
    return %c0_i32, %c0_i32_0 : i32, i32
  }
  func.func @transform_4(%arg0: i32) -> (i32, i32, i32) {
    %c0_i32 = arith.constant 0 : i32
    %c0_i32_0 = arith.constant 0 : i32
    %c0_i32_1 = arith.constant 0 : i32
    %c0_i32_2 = arith.constant 0 : i32
    return %c0_i32, %c0_i32_0, %c0_i32_1 : i32, i32, i32
  }
  func.func @transform_5(%arg0: i32) -> (i32, i32, i32) {
    %c0_i32 = arith.constant 0 : i32
    %c0_i32_0 = arith.constant 0 : i32
    %c0_i32_1 = arith.constant 0 : i32
    return %arg0, %c0_i32, %c0_i32_0 : i32, i32, i32
  }
}

</mosaic_0001>

<bundles_post_ra>
// kernel: fcs_attention_forward.1
= control target key start
LH: loop header
LB: loop body
LE: loop exit
PB: predicated region body
PF: predicated region fallthrough
CT: control target
= control target key end

     0   :  { %vm116_vm0 = vcmask 31744   ;;  %vm495_vm1 = vcmask 1040384   ;;  %vm498_vm2 = vcmask 1041408   ;;  %vm501_vm3 = vcmask 1042432   ;;  %s1603_s16 = smov 50   ;;  %s1604_s17 = smov 49   ;;  %s2922_s0 = inlined_call_operand.vmem [shape: f32[2,64,256], index: 0, kind: input, shape index: {}]   ;;  %s2923_s1 = inlined_call_operand.vmem [shape: f32[64,256], index: 1, kind: input, shape index: {}]   ;;  %s2924_s2 = inlined_call_operand.vmem [shape: f32[64,4], index: 2, kind: input, shape index: {}]   ;;  %s2925_s3 = inlined_call_operand.vmem [shape: f32[64,4], index: 3, kind: input, shape index: {}]   ;;  %s2926_s4 = inlined_call_operand.vmem [shape: f32[49,4,256], index: 4, kind: input, shape index: {}]   ;;  %s2927_s5 = inlined_call_operand.vmem [shape: f32[2,64,256], index: 5, kind: output, shape index: {}]  }
   0x1   :  { %v20_v0 = vld [vmem:[%s2923_s1] sm:$0xff]  ;;  %v21_v1 = vld [vmem:[%s2923_s1 + $0x8] sm:$0xff]  ;;  %v22_v10 = vld [vmem:[%s2923_s1 + $0x10] sm:$0xff]  ;;  %s1605_s18 = smov 48   ;;  %s1606_s19 = smov 47  }
   0x2   :  { %v1689_v2 = vld [vmem:[%s2922_s0 + $0x80] sm:$0xff]  ;;  %v1694_v3 = vld [vmem:[%s2922_s0 + $0x88] sm:$0xff]  ;;  %v23_v11 = vld [vmem:[%s2923_s1 + $0x18] sm:$0xff]  ;;  %s1607_s20 = smov 46   ;;  %s1608_s21 = smov 45  }
   0x3   :  { %v291_v4 = vmul.f32 %v1689_v2, %v20_v0  ;;  %v1700_v5 = vld [vmem:[%s2922_s0] sm:$0xff]  ;;  %v1705_v6 = vld [vmem:[%s2922_s0 + $0x8] sm:$0xff]  ;;  %v292_v7 = vmul.f32 %v1694_v3, %v21_v1  ;;  %v1719_v12 = vld [vmem:[%s2922_s0 + $0x90] sm:$0xff]  ;;  %s1609_s22 = smov 35   ;;  %s1610_s23 = smov 34  }
   0x4   :  { %v68_v8 = vmul.f32 %v1700_v5, %v20_v0  ;;  %v69_v9 = vmul.f32 %v1705_v6, %v21_v1  ;;  %v1724_v13 = vld [vmem:[%s2922_s0 + $0x98] sm:$0xff]  ;;  %v293_v14 = vmul.f32 %v1719_v12, %v22_v10  ;;  %v1730_v15 = vld [vmem:[%s2922_s0 + $0x10] sm:$0xff]  ;;  %v24_v21 = vld [vmem:[%s2923_s1 + $0x20] sm:$0xff]  ;;  %s1611_s24 = smov 33   ;;  %s1612_s25 = smov 32  }
   0x5   :  { %v1735_v16 = vld [vmem:[%s2922_s0 + $0x18] sm:$0xff]  ;;  %v307_v17 = vadd.f32 %v292_v7, %v291_v4  ;;  %v294_v19 = vmul.f32 %v1724_v13, %v23_v11  ;;  %v70_v20 = vmul.f32 %v1730_v15, %v22_v10  ;;  %v25_v22 = vld [vmem:[%s2923_s1 + $0x28] sm:$0xff]  ;;  %v1748_v23 = vld [vmem:[%s2922_s0 + $0xa0] sm:$0xff]  ;;  %s1613_s26 = smov 31   ;;  %s1614_s27 = smov 30  }
   0x6   :  { %v84_v18 = vadd.f32 %v69_v9, %v68_v8  ;;  %v71_v24 = vmul.f32 %v1735_v16, %v23_v11  ;;  %v1754_v25 = vld [vmem:[%s2922_s0 + $0xa8] sm:$0xff]  ;;  %v295_v26 = vmul.f32 %v1748_v23, %v24_v21  ;;  %v1760_v27 = vld [vmem:[%s2922_s0 + $0x20] sm:$0xff]  ;;  %v26_v32 = vld [vmem:[%s2923_s1 + $0x30] sm:$0xff]  ;;  %s1616_s28 = smov 19   ;;  %s1617_s29 = smov 18  }
   0x7   :  { %v1765_v28 = vld [vmem:[%s2922_s0 + $0x28] sm:$0xff]  ;;  %308 = vadd.xlane.f32.xlu1 %v307_v17  ;;  %v310_v29 = vadd.f32 %v294_v19, %v293_v14  ;;  %v296_v30 = vmul.f32 %v1754_v25, %v25_v22  ;;  %v72_v31 = vmul.f32 %v1760_v27, %v24_v21  ;;  %v27_v33 = vld [vmem:[%s2923_s1 + $0x38] sm:$0xff]  ;;  %v1778_v34 = vld [vmem:[%s2922_s0 + $0xb0] sm:$0xff]  ;;  %s1618_s30 = smov 17   ;;  %s1619_s6 = smov 16  }
   0x8   :  { %85 = vadd.xlane.f32.xlu0 %v84_v18  ;;  %v87_v35 = vadd.f32 %v71_v24, %v70_v20  ;;  %v73_v36 = vmul.f32 %v1765_v28, %v25_v22  ;;  %v1784_v37 = vld [vmem:[%s2922_s0 + $0xb8] sm:$0xff]  ;;  %v1789_v38 = vld [vmem:[%s2922_s0 + $0x30] sm:$0xff]  ;;  %v297_v41 = vmul.f32 %v1778_v34, %v26_v32  ;;  %v28_v43 = vld [vmem:[%s2923_s1 + $0x40] sm:$0xff]  ;;  %s1620_s7 = smov 15   ;;  %s1621_s8 = smov 14  }
   0x9   :  { %v1794_v39 = vld [vmem:[%s2922_s0 + $0x38] sm:$0xff]  ;;  %v313_v40 = vadd.f32 %v296_v30, %v295_v26  ;;  %v298_v42 = vmul.f32 %v1784_v37, %v27_v33  ;;  %v74_v45 = vmul.f32 %v1789_v38, %v26_v32  ;;  %v29_v47 = vld [vmem:[%s2923_s1 + $0x48] sm:$0xff]  ;;  %v1809_v48 = vld [vmem:[%s2922_s0 + $0xc0] sm:$0xff]  ;;  %s1622_s9 = smov 13   ;;  %s1623_s10 = smov 3  }
   0xa   :  { %v90_v44 = vadd.f32 %v73_v36, %v72_v31  ;;  %v75_v46 = vmul.f32 %v1794_v39, %v27_v33  ;;  %v1814_v49 = vld [vmem:[%s2922_s0 + $0xc8] sm:$0xff]  ;;  %v1819_v50 = vld [vmem:[%s2922_s0 + $0x40] sm:$0xff]  ;;  %v299_v53 = vmul.f32 %v1809_v48, %v28_v43  ;;  %v30_v55 = vld [vmem:[%s2923_s1 + $0x50] sm:$0xff]  ;;  %s1624_s11 = smov 2   ;;  %s1625_s12 = smov 1  }
   0xb   :  { %311 = vadd.xlane.f32.xlu1 %v310_v29  ;;  %v1824_v51 = vld [vmem:[%s2922_s0 + $0x48] sm:$0xff]  ;;  %v316_v52 = vadd.f32 %v298_v42, %v297_v41  ;;  %v300_v54 = vmul.f32 %v1814_v49, %v29_v47  ;;  %v76_v57 = vmul.f32 %v1819_v50, %v28_v43  ;;  %v31_v59 = vld [vmem:[%s2923_s1 + $0x58] sm:$0xff]  ;;  %v1839_v60 = vld [vmem:[%s2922_s0 + $0xd0] sm:$0xff]  ;;  %s1626_s13 = smov 127   ;;  %s1629_s14 = smov 115  }
   0xc   :  { %88 = vadd.xlane.f32.xlu0 %v87_v35  ;;  %v93_v56 = vadd.f32 %v75_v46, %v74_v45  ;;  %v77_v58 = vmul.f32 %v1824_v51, %v29_v47  ;;  %v1844_v61 = vld [vmem:[%s2922_s0 + $0xd8] sm:$0xff]  ;;  %v1849_v62 = vld [vmem:[%s2922_s0 + $0x50] sm:$0xff]  ;;  %v301_v1 = vmul.f32 %v1839_v60, %v30_v55  ;;  %v32_v7 = vld [vmem:[%s2923_s1 + $0x60] sm:$0xff]  ;;  %s1630_s15 = smov 114  }
   0xd   :  { %v1854_v63 = vld [vmem:[%s2922_s0 + $0x58] sm:$0xff]  ;;  %v319_v0 = vadd.f32 %v300_v54, %v299_v53  ;;  %v302_v4 = vmul.f32 %v1844_v61, %v31_v59  ;;  %v78_v9 = vmul.f32 %v1849_v62, %v30_v55  ;;  %v33_v11 = vld [vmem:[%s2923_s1 + $0x68] sm:$0xff]  ;;  %v1869_v14 = vld [vmem:[%s2922_s0 + $0xe0] sm:$0xff] }
   0xe   :  { %v96_v8 = vadd.f32 %v77_v58, %v76_v57  ;;  %v79_v10 = vmul.f32 %v1854_v63, %v31_v59  ;;  %v1874_v17 = vld [vmem:[%s2922_s0 + $0xe8] sm:$0xff]  ;;  %v1879_v18 = vld [vmem:[%s2922_s0 + $0x60] sm:$0xff]  ;;  %v303_v21 = vmul.f32 %v1869_v14, %v32_v7  ;;  %v34_v24 = vld [vmem:[%s2923_s1 + $0x70] sm:$0xff] }
   0xf   :  { %314 = vadd.xlane.f32.xlu1 %v313_v40  ;;  %v1884_v19 = vld [vmem:[%s2922_s0 + $0x68] sm:$0xff]  ;;  %v322_v20 = vadd.f32 %v302_v4, %v301_v1  ;;  %v304_v22 = vmul.f32 %v1874_v17, %v33_v11  ;;  %v80_v29 = vmul.f32 %v1879_v18, %v32_v7  ;;  %v35_v31 = vld [vmem:[%s2923_s1 + $0x78] sm:$0xff]  ;;  %v1899_v32 = vld [vmem:[%s2922_s0 + $0xf0] sm:$0xff]  ;;  %s1628_s1 = smov 125  }
  0x10   :  { %91 = vadd.xlane.f32.xlu0 %v90_v44  ;;  %v99_v26 = vadd.f32 %v79_v10, %v78_v9  ;;  %v81_v30 = vmul.f32 %v1884_v19, %v33_v11  ;;  %v1904_v33 = vld [vmem:[%s2922_s0 + $0xf8] sm:$0xff]  ;;  %v1909_v35 = vld [vmem:[%s2922_s0 + $0x70] sm:$0xff]  ;;  %v305_v41 = vmul.f32 %v1899_v32, %v34_v24  ;;  %v37_v58 = vld [vmem:[%s2924_s2 + $0x8] sm:$0xff] }
  0x11   :  { %v1914_v36 = vld [vmem:[%s2922_s0 + $0x78] sm:$0xff]  ;;  %v325_v40 = vadd.f32 %v304_v22, %v303_v21  ;;  %v306_v42 = vmul.f32 %v1904_v33, %v35_v31  ;;  %v82_v44 = vmul.f32 %v1909_v35, %v34_v24  ;;  %v36_v59 = vld [vmem:[%s2924_s2] sm:$0xff]  ;;  %v38_v1 = vld [vmem:[%s2924_s2 + $0x10] sm:$0xff]  ;;  %s1627_s0 = smov 126  }
  0x12   :  { %v102_v43 = vadd.f32 %v81_v30, %v80_v29  ;;  %v83_v45 = vmul.f32 %v1914_v36, %v35_v31  ;;  %v39_v11 = vld [vmem:[%s2924_s2 + $0x18] sm:$0xff]  ;;  %v40_v24 = vld [vmem:[%s2924_s2 + $0x20] sm:$0xff] }
  0x13   :  { %317 = vadd.xlane.f32.xlu1 %v316_v52  ;;  %v328_v46 = vadd.f32 %v306_v42, %v305_v41 }
  0x14   :  { %94 = vadd.xlane.f32.xlu0 %v93_v56  ;;  %v105_v47 = vadd.f32 %v83_v45, %v82_v44 }
  0x17   :  { %320 = vadd.xlane.f32.xlu1 %v319_v0 }
  0x18   :  { %97 = vadd.xlane.f32.xlu0 %v96_v8 }
  0x1b   :  { %323 = vadd.xlane.f32.xlu1 %v322_v20 }
  0x1c   :  { %100 = vadd.xlane.f32.xlu0 %v99_v26 }
  0x1f   :  { %326 = vadd.xlane.f32.xlu1 %v325_v40 }
  0x20   :  { %103 = vadd.xlane.f32.xlu0 %v102_v43  ;;  %v41_v43 = vld [vmem:[%s2924_s2 + $0x28] sm:$0xff] }
  0x23   :  { %329 = vadd.xlane.f32.xlu1 %v328_v46 }
  0x24   :  { %106 = vadd.xlane.f32.xlu0 %v105_v47 }
  0x94   :  { %v309_v52 = vpop.xlane.xlu1 %308 }
  0x95   :  { %v86_v53 = vpop.xlane.xlu0 %85  ;;  %v331_v0 = vmul.f32 %v309_v52, %v36_v59 }
  0x96   :  { %v108_v10 = vmul.f32 %v86_v53, %v36_v59 }
  0x97   :  { %v339_v22 = vsel %vm116_vm0, %v331_v0, 0.0 }
  0x98   :  { %v312_v54 = vpop.xlane.xlu1 %311  ;;  %v117_v42 = vsel %vm116_vm0, %v108_v10, 0.0 }
  0x99   :  { %v89_v55 = vpop.xlane.xlu0 %88  ;;  %v332_v8 = vmul.f32 %v312_v54, %v37_v58 }
  0x9a   :  { %v109_v9 = vmul.f32 %v89_v55, %v37_v58 }
  0x9b   :  { %v340_v30 = vsel %vm116_vm0, %v332_v8, 0.0 }
  0x9c   :  { %v315_v56 = vpop.xlane.xlu1 %314  ;;  %v118_v31 = vsel %vm116_vm0, %v109_v9, 0.0  ;;  %v341_v52 = vadd.f32 %v340_v30, %v339_v22 }
  0x9d   :  { %v92_v57 = vpop.xlane.xlu0 %91  ;;  %v333_v20 = vmul.f32 %v315_v56, %v38_v1  ;;  %v119_v53 = vadd.f32 %v118_v31, %v117_v42  ;;  %v43_v31 = vld [vmem:[%s2924_s2 + $0x38] sm:$0xff] }
  0x9e   :  { %v110_v21 = vmul.f32 %v92_v57, %v38_v1 }
  0x9f   :  { %v342_v44 = vsel %vm116_vm0, %v333_v20, 0.0 }
  0xa0   :  { %v318_v4 = vpop.xlane.xlu1 %317  ;;  %v120_v45 = vsel %vm116_vm0, %v110_v21, 0.0  ;;  %v343_v0 = vadd.f32 %v342_v44, %v341_v52 }
  0xa1   :  { %v95_v7 = vpop.xlane.xlu0 %94  ;;  %v334_v40 = vmul.f32 %v318_v4, %v39_v11  ;;  %v121_v1 = vadd.f32 %v120_v45, %v119_v53  ;;  %v42_v4 = vld [vmem:[%s2924_s2 + $0x30] sm:$0xff]  ;;  %s1615_s2 = smov 29  }
  0xa2   :  { %v111_v41 = vmul.f32 %v95_v7, %v39_v11 }
  0xa3   :  { %v344_v56 = vsel %vm116_vm0, %v334_v40, 0.0 }
  0xa4   :  { %v321_v26 = vpop.xlane.xlu1 %320  ;;  %v122_v57 = vsel %vm116_vm0, %v111_v41, 0.0  ;;  %v345_v9 = vadd.f32 %v344_v56, %v343_v0 }
  0xa5   :  { %v98_v29 = vpop.xlane.xlu0 %97  ;;  %v335_v46 = vmul.f32 %v321_v26, %v40_v24  ;;  %v123_v10 = vadd.f32 %v122_v57, %v121_v1 }
  0xa6   :  { %v112_v47 = vmul.f32 %v98_v29, %v40_v24 }
  0xa7   :  { %v346_v7 = vsel %vm116_vm0, %v335_v46, 0.0 }
  0xa8   :  { %v324_v54 = vpop.xlane.xlu1 %323  ;;  %v124_v8 = vsel %vm116_vm0, %v112_v47, 0.0  ;;  %v347_v29 = vadd.f32 %v346_v7, %v345_v9 }
  0xa9   :  { %v101_v55 = vpop.xlane.xlu0 %100  ;;  %v336_v58 = vmul.f32 %v324_v54, %v41_v43  ;;  %v125_v30 = vadd.f32 %v124_v8, %v123_v10 }
  0xaa   :  { %v113_v59 = vmul.f32 %v101_v55, %v41_v43 }
  0xab   :  { %v348_v21 = vsel %vm116_vm0, %v336_v58, 0.0 }
  0xac   :  { %v327_v11 = vpop.xlane.xlu1 %326  ;;  %v126_v22 = vsel %vm116_vm0, %v113_v59, 0.0  ;;  %v349_v42 = vadd.f32 %v348_v21, %v347_v29 }
  0xad   :  { %v104_v20 = vpop.xlane.xlu0 %103  ;;  %v337_v24 = vmul.f32 %v327_v11, %v42_v4  ;;  %v127_v43 = vadd.f32 %v126_v22, %v125_v30  ;;  %v45_v22 = vld [vmem:[%s2925_s3 + $0x8] sm:$0xff] }
  0xae   :  { %v114_v26 = vmul.f32 %v104_v20, %v42_v4 }
  0xaf   :  { %v350_v40 = vsel %vm116_vm0, %v337_v24, 0.0  ;;  %v44_v24 = vld [vmem:[%s2925_s3] sm:$0xff] }
  0xb0   :  { %v128_v41 = vsel %vm116_vm0, %v114_v26, 0.0  ;;  %v330_v44 = vpop.xlane.xlu1 %329  ;;  %v351_v52 = vadd.f32 %v350_v40, %v349_v42 }
  0xb1   :  { %v107_v45 = vpop.xlane.xlu0 %106  ;;  %v338_v46 = vmul.f32 %v330_v44, %v43_v31  ;;  %v129_v53 = vadd.f32 %v128_v41, %v127_v43  ;;  %v46_v44 = vld [vmem:[%s2925_s3 + $0x10] sm:$0xff] }
  0xb2   :  { %v115_v47 = vmul.f32 %v107_v45, %v43_v31 }
  0xb3   :  { %v352_v54 = vsel %vm116_vm0, %v338_v46, 0.0 }
  0xb4   :  { %v130_v55 = vsel %vm116_vm0, %v115_v47, 0.0  ;;  %v353_v56 = vadd.f32 %v352_v54, %v351_v52 }
  0xb5   :  { %v131_v57 = vadd.f32 %v130_v55, %v129_v53  ;;  %v47_v53 = vld [vmem:[%s2925_s3 + $0x18] sm:$0xff] }
  0xb6   :  { %v354_v58 = vrot.slane %v353_v56, 4 }
  0xb7   :  { %v132_v59 = vrot.slane %v131_v57, 4 }
  0xb8   :  { %v355_v0 = vadd.f32 %v354_v58, %v353_v56  ;;  %v48_v58 = vld [vmem:[%s2925_s3 + $0x20] sm:$0xff] }
  0xb9   :  { %v133_v1 = vadd.f32 %v132_v59, %v131_v57 }
  0xba   :  { %v356_v4 = vrot.slane %v355_v0, 2 }
  0xbb   :  { %v134_v7 = vrot.slane %v133_v1, 2 }
  0xbc   :  { %v357_v8 = vadd.f32 %v356_v4, %v355_v0 }
  0xbd   :  { %v135_v9 = vadd.f32 %v134_v7, %v133_v1  ;;  %v49_v7 = vld [vmem:[%s2925_s3 + $0x28] sm:$0xff] }
  0xbe   :  { %v358_v10 = vrot.slane %v357_v8, 1 }
  0xbf   :  { %v136_v11 = vrot.slane %v135_v9, 1 }
  0xc0   :  { %v359_v20 = vadd.f32 %v358_v10, %v357_v8 }
  0xc1   :  { %v137_v21 = vadd.f32 %v136_v11, %v135_v9 }
  0xc2   :  { %v360_v26 = vmax.f32 %v359_v20, 0.0  ;;  %v50_v20 = vld [vmem:[%s2925_s3 + $0x30] sm:$0xff] }
  0xc3   :  { %v138_v29 = vmax.f32 %v137_v21, 0.0 }
  0xc4   :  { %v362_v42 = vmul.f32 %v360_v26, %v45_v22  ;;  %v361_v43 = vmul.f32 %v360_v26, %v44_v24  ;;  %v363_v47 = vmul.f32 %v360_v26, %v46_v44  ;;  %v364_v56 = vmul.f32 %v360_v26, %v47_v53 }
  0xc5   :  { %v140_v30 = vmul.f32 %v138_v29, %v45_v22  ;;  %v139_v31 = vmul.f32 %v138_v29, %v44_v24  ;;  %v141_v52 = vmul.f32 %v138_v29, %v46_v44  ;;  %v142_v57 = vmul.f32 %v138_v29, %v47_v53 }
  0xc6   :  { %v372_v45 = vsel %vm116_vm0, %v362_v42, 0.0  ;;  %v369_v46 = vsel %vm116_vm0, %v361_v43, 0.0  ;;  %v375_v54 = vsel %vm116_vm0, %v363_v47, 0.0  ;;  %v378_v59 = vsel %vm116_vm0, %v364_v56, 0.0 }
  0xc7   :  { %v150_v40 = vsel %vm116_vm0, %v140_v30, 0.0  ;;  %v147_v41 = vsel %vm116_vm0, %v139_v31, 0.0  ;;  %v153_v55 = vsel %vm116_vm0, %v141_v52, 0.0  ;;  %v156_v0 = vsel %vm116_vm0, %v142_v57, 0.0  ;;  %v51_v31 = vld [vmem:[%s2925_s3 + $0x38] sm:$0xff]  ;;  %s1602_s3 = smov 51  }
  0xc8   :  { %151 = vadd.xlane.f32.xlu1 %v150_v40  ;;  %148 = vadd.xlane.f32.xlu0 %v147_v41  ;;  %v365_v1 = vmul.f32 %v360_v26, %v48_v58  ;;  %v143_v4 = vmul.f32 %v138_v29, %v48_v58  ;;  %v366_v10 = vmul.f32 %v360_v26, %v49_v7 }
  0xc9   :  { %v144_v11 = vmul.f32 %v138_v29, %v49_v7  ;;  %v367_v24 = vmul.f32 %v360_v26, %v50_v20  ;;  %v145_v30 = vmul.f32 %v138_v29, %v50_v20  ;;  %v368_v42 = vmul.f32 %v360_v26, %v51_v31 }
  0xca   :  { %v381_v8 = vsel %vm116_vm0, %v365_v1, 0.0  ;;  %v159_v9 = vsel %vm116_vm0, %v143_v4, 0.0  ;;  %v384_v21 = vsel %vm116_vm0, %v366_v10, 0.0  ;;  %v146_v43 = vmul.f32 %v138_v29, %v51_v31 }
  0xcb   :  { %v162_v22 = vsel %vm116_vm0, %v144_v11, 0.0  ;;  %v387_v40 = vsel %vm116_vm0, %v367_v24, 0.0  ;;  %v165_v41 = vsel %vm116_vm0, %v145_v30, 0.0  ;;  %v390_v44 = vsel %vm116_vm0, %v368_v42, 0.0 }
  0xcc   :  { %373 = vadd.xlane.f32.xlu1 %v372_v45  ;;  %370 = vadd.xlane.f32.xlu0 %v369_v46  ;;  %v168_v45 = vsel %vm116_vm0, %v146_v43, 0.0 }
  0xd0   :  { %376 = vadd.xlane.f32.xlu1 %v375_v54  ;;  %154 = vadd.xlane.f32.xlu0 %v153_v55 }
  0xd4   :  { %379 = vadd.xlane.f32.xlu1 %v378_v59  ;;  %157 = vadd.xlane.f32.xlu0 %v156_v0 }
  0xd8   :  { %382 = vadd.xlane.f32.xlu1 %v381_v8  ;;  %160 = vadd.xlane.f32.xlu0 %v159_v9 }
  0xdc   :  { %385 = vadd.xlane.f32.xlu1 %v384_v21  ;;  %163 = vadd.xlane.f32.xlu0 %v162_v22 }
  0xe0   :  { %388 = vadd.xlane.f32.xlu1 %v387_v40  ;;  %166 = vadd.xlane.f32.xlu0 %v165_v41 }
  0xe4   :  { %391 = vadd.xlane.f32.xlu1 %v390_v44  ;;  %169 = vadd.xlane.f32.xlu0 %v168_v45 }
 0x155   :  { %v152_v46 = vpop.xlane.xlu1 %151  ;;  %v149_v47 = vpop.xlane.xlu0 %148 }
 0x156   :  { %v172_v52 = vmul.f32 0.5, %v152_v46  ;;  %v171_v57 = vmul.f32 0.5, %v149_v47 }
 0x158   :  { %1566 = vtanh.f32 %v172_v52 }
 0x159   :  { %v374_v53 = vpop.xlane.xlu1 %373  ;;  %v371_v54 = vpop.xlane.xlu0 %370 }
 0x15a   :  { %v394_v55 = vmul.f32 0.5, %v374_v53  ;;  %v393_v56 = vmul.f32 0.5, %v371_v54 }
 0x15c   :  { %1568 = vtanh.f32 %v394_v55 }
 0x15d   :  { %v377_v26 = vpop.xlane.xlu1 %376  ;;  %v155_v29 = vpop.xlane.xlu0 %154  ;;  %1570 = vtanh.f32 %v393_v56 }
 0x15e   :  { %v395_v58 = vmul.f32 0.5, %v377_v26  ;;  %1572 = vtanh.f32 %v171_v57  ;;  %v173_v59 = vmul.f32 0.5, %v155_v29 }
 0x160   :  { %1574 = vtanh.f32 %v395_v58 }
 0x161   :  { %v380_v0 = vpop.xlane.xlu1 %379  ;;  %v158_v1 = vpop.xlane.xlu0 %157  ;;  %1576 = vtanh.f32 %v173_v59 }
 0x162   :  { %v396_v4 = vmul.f32 0.5, %v380_v0  ;;  %v174_v7 = vmul.f32 0.5, %v158_v1  ;;  %v1567_v10 = vpop.eup %1566 }
 0x163   :  { %v188_v41 = vmul.f32 0.5, %v1567_v10 }
 0x164   :  { %1578 = vtanh.f32 %v396_v4 }
 0x165   :  { %v383_v8 = vpop.xlane.xlu1 %382  ;;  %v161_v9 = vpop.xlane.xlu0 %160  ;;  %1580 = vtanh.f32 %v174_v7  ;;  %v196_v55 = vadd.f32 0.5, %v188_v41 }
 0x166   :  { %v397_v11 = vmul.f32 0.5, %v383_v8  ;;  %v175_v20 = vmul.f32 0.5, %v161_v9  ;;  %v1569_v21 = vpop.eup %1568 }
 0x167   :  { %v1571_v22 = vpop.eup %1570  ;;  %v410_v42 = vmul.f32 0.5, %v1569_v21  ;;  %v2001_v8 = vmul.f32 %v196_v55, %v1730_v15  ;;  %v2019_v41 = vmul.f32 %v196_v55, %v1735_v16 }
 0x168   :  { %v1573_v24 = vpop.eup %1572  ;;  %1582 = vtanh.f32 %v397_v11  ;;  %v409_v44 = vmul.f32 0.5, %v1571_v22 }
 0x169   :  { %v386_v30 = vpop.xlane.xlu1 %385  ;;  %v164_v31 = vpop.xlane.xlu0 %163  ;;  %1584 = vtanh.f32 %v175_v20  ;;  %v187_v46 = vmul.f32 0.5, %v1573_v24  ;;  %v418_v56 = vadd.f32 0.5, %v410_v42  ;;  %2963 = vst [vmem:[#allocation6_spill] sm:$0xff] %v2019_v41 }
 0x16a   :  { %v1575_v40 = vpop.eup %1574  ;;  %v398_v43 = vmul.f32 0.5, %v386_v30  ;;  %v176_v45 = vmul.f32 0.5, %v164_v31  ;;  %v417_v29 = vadd.f32 0.5, %v409_v44 }
 0x16b   :  { %v1577_v47 = vpop.eup %1576  ;;  %v411_v52 = vmul.f32 0.5, %v1575_v40  ;;  %v195_v59 = vadd.f32 0.5, %v187_v46  ;;  %v2004_v9 = vmul.f32 %v1719_v12, %v418_v56  ;;  %v2007_v20 = vmul.f32 %v1724_v13, %v418_v56 }
 0x16c   :  { %1586 = vtanh.f32 %v398_v43  ;;  %v189_v0 = vmul.f32 0.5, %v1577_v47  ;;  %v2010_v21 = vmul.f32 %v1689_v2, %v417_v29  ;;  %v2013_v22 = vmul.f32 %v1694_v3, %v417_v29 }
 0x16d   :  { %v389_v53 = vpop.xlane.xlu1 %388  ;;  %v167_v54 = vpop.xlane.xlu0 %166  ;;  %1588 = vtanh.f32 %v176_v45  ;;  %v419_v4 = vadd.f32 0.5, %v411_v52  ;;  %2959 = vst [vmem:[#allocation2_spill] sm:$0xff] %v2004_v9  ;;  %2960 = vst [vmem:[#allocation3_spill] sm:$0xff] %v2007_v20  ;;  %v2016_v15 = vmul.f32 %v195_v59, %v1700_v5  ;;  %v2022_v13 = vmul.f32 %v195_v59, %v1705_v6 }
 0x16e   :  { %v399_v57 = vmul.f32 0.5, %v389_v53  ;;  %v1579_v26 = vpop.eup %1578  ;;  %v177_v58 = vmul.f32 0.5, %v167_v54  ;;  %2961 = vst [vmem:[#allocation4_spill] sm:$0xff] %v2010_v21  ;;  %2962 = vst [vmem:[#allocation5_spill] sm:$0xff] %v2013_v22  ;;  %v197_v31 = vadd.f32 0.5, %v189_v0  ;;  %v441_v45 = vadd.f32 %v2004_v9, %v2010_v21 }
 0x16f   :  { %v1581_v1 = vpop.eup %1580  ;;  %v412_v10 = vmul.f32 0.5, %v1579_v26  ;;  %2964 = vst [vmem:[#allocation7_spill] sm:$0xff] %v2022_v13  ;;  %v2025_v2 = vmul.f32 %v1748_v23, %v419_v4  ;;  %v2028_v3 = vmul.f32 %v1754_v25, %v419_v4  ;;  %v454_v16 = vadd.f32 %v2007_v20, %v2013_v22 }
 0x170   :  { %1590 = vtanh.f32 %v399_v57  ;;  %v190_v12 = vmul.f32 0.5, %v1581_v1  ;;  %v219_v23 = vadd.f32 %v2001_v8, %v2016_v15  ;;  %v2037_v47 = vmul.f32 %v197_v31, %v1760_v27 }
 0x171   :  { %v392_v7 = vpop.xlane.xlu1 %391  ;;  %1592 = vtanh.f32 %v177_v58  ;;  %v170_v24 = vpop.xlane.xlu0 %169  ;;  %2965 = vst [vmem:[#allocation8_spill] sm:$0xff] %v2025_v2  ;;  %2966 = vst [vmem:[#allocation9_spill] sm:$0xff] %v2028_v3  ;;  %v420_v42 = vadd.f32 0.5, %v412_v10  ;;  %v2040_v25 = vmul.f32 %v197_v31, %v1765_v28  ;;  %v232_v53 = vadd.f32 %v2019_v41, %v2022_v13 }
 0x172   :  { %v1583_v11 = vpop.eup %1582  ;;  %v400_v40 = vmul.f32 0.5, %v392_v7  ;;  %v178_v44 = vmul.f32 0.5, %v170_v24  ;;  %2967 = vst [vmem:[#allocation10_spill] sm:$0xff] %v2037_v47  ;;  %v198_v52 = vadd.f32 0.5, %v190_v12  ;;  %v442_v54 = vadd.f32 %v441_v45, %v2025_v2 }
 0x173   :  { %v1585_v30 = vpop.eup %1584  ;;  %v413_v43 = vmul.f32 0.5, %v1583_v11  ;;  %2968 = vst [vmem:[#allocation11_spill] sm:$0xff] %v2040_v25  ;;  %v455_v55 = vadd.f32 %v454_v16, %v2028_v3  ;;  %v469_v56 = vmax.f32 %v2010_v21, %v2025_v2  ;;  %v2049_v26 = vmul.f32 %v1778_v34, %v420_v42  ;;  %v2532_v2 = vld [vmem:[%s2926_s4 + $0x148] sm:$0xff]  ;;  %v2547_v21 = vld [vmem:[%s2926_s4 + $0x150] sm:$0xff] }
 0x174   :  { %v191_v46 = vmul.f32 0.5, %v1585_v30  ;;  %1594 = vtanh.f32 %v400_v40  ;;  %v482_v28 = vmax.f32 %v2013_v22, %v2028_v3  ;;  %v2054_v58 = vmul.f32 %v1784_v37, %v420_v42 }
 0x175   :  { %2969 = vst [vmem:[#allocation12_spill] sm:$0xff] %v2049_v26  ;;  %v421_v27 = vadd.f32 0.5, %v413_v43  ;;  %1596 = vtanh.f32 %v178_v44  ;;  %v220_v1 = vadd.f32 %v219_v23, %v2037_v47  ;;  %v233_v4 = vadd.f32 %v232_v53, %v2040_v25 }
 0x176   :  { %v1587_v5 = vpop.eup %1586  ;;  %2970 = vst [vmem:[#allocation13_spill] sm:$0xff] %v2054_v58  ;;  %v199_v59 = vadd.f32 0.5, %v191_v46  ;;  %v248_v7 = vmax.f32 %v2016_v15, %v2037_v47  ;;  %v2061_v34 = vmul.f32 %v198_v52, %v1789_v38  ;;  %v261_v11 = vmax.f32 %v2022_v13, %v2040_v25 }
 0x177   :  { %v1589_v6 = vpop.eup %1588  ;;  %v414_v29 = vmul.f32 0.5, %v1587_v5  ;;  %v2066_v24 = vmul.f32 %v198_v52, %v1794_v39  ;;  %v443_v31 = vadd.f32 %v442_v54, %v2049_v26  ;;  %v2070_v12 = vmul.f32 %v1809_v48, %v421_v27 }
 0x178   :  { %v192_v0 = vmul.f32 0.5, %v1589_v6  ;;  %2971 = vst [vmem:[#allocation14_spill] sm:$0xff] %v2061_v34  ;;  %v2073_v40 = vmul.f32 %v1814_v49, %v421_v27  ;;  %v456_v38 = vadd.f32 %v455_v55, %v2054_v58  ;;  %v470_v43 = vmax.f32 %v2004_v9, %v2049_v26  ;;  %v2508_v26 = vld [vmem:[%s2926_s4 + $0x130] sm:$0xff] }
 0x179   :  { %2972 = vst [vmem:[#allocation15_spill] sm:$0xff] %v2066_v24  ;;  %v422_v37 = vadd.f32 0.5, %v414_v29  ;;  %2973 = vst [vmem:[#allocation16_spill] sm:$0xff] %v2070_v12  ;;  %v2079_v44 = vmul.f32 %v199_v59, %v1819_v50  ;;  %v483_v5 = vmax.f32 %v2007_v20, %v2054_v58  ;;  %v221_v45 = vadd.f32 %v220_v1, %v2061_v34  ;;  %v2503_v58 = vld [vmem:[%s2926_s4 + $0x128] sm:$0xff]  ;;  %v2519_v20 = vld [vmem:[%s2926_s4 + $0x138] sm:$0xff] }
 0x17a   :  { %v1591_v57 = vpop.eup %1590  ;;  %2974 = vst [vmem:[#allocation17_spill] sm:$0xff] %v2073_v40  ;;  %v200_v39 = vadd.f32 0.5, %v192_v0  ;;  %v2085_v48 = vmul.f32 %v199_v59, %v1824_v51  ;;  %v234_v46 = vadd.f32 %v233_v4, %v2066_v24  ;;  %v249_v6 = vmax.f32 %v2001_v8, %v2061_v34 }
 0x17b   :  { %v1593_v10 = vpop.eup %1592  ;;  %v415_v30 = vmul.f32 0.5, %v1591_v57  ;;  %2975 = vst [vmem:[#allocation18_spill] sm:$0xff] %v2079_v44  ;;  %v262_v50 = vmax.f32 %v2019_v41, %v2066_v24  ;;  %v2093_v23 = vmul.f32 %v1839_v60, %v422_v37  ;;  %v444_v52 = vadd.f32 %v443_v31, %v2070_v12 }
 0x17c   :  { %v193_v42 = vmul.f32 0.5, %v1593_v10  ;;  %2976 = vst [vmem:[#allocation19_spill] sm:$0xff] %v2085_v48  ;;  %v457_v53 = vadd.f32 %v456_v38, %v2073_v40  ;;  %v2098_v51 = vmul.f32 %v1844_v61, %v422_v37  ;;  %v471_v55 = vmax.f32 %v469_v56, %v2070_v12 }
 0x17d   :  { %v423_v49 = vadd.f32 0.5, %v415_v30  ;;  %2977 = vst [vmem:[#allocation20_spill] sm:$0xff] %v2093_v23  ;;  %v484_v57 = vmax.f32 %v482_v28, %v2073_v40  ;;  %v222_v27 = vadd.f32 %v221_v45, %v2079_v44  ;;  %v2104_v29 = vmul.f32 %v200_v39, %v1849_v62 }
 0x17e   :  { %v1595_v16 = vpop.eup %1594  ;;  %2978 = vst [vmem:[#allocation21_spill] sm:$0xff] %v2098_v51  ;;  %v201_v54 = vadd.f32 0.5, %v193_v42  ;;  %v235_v60 = vadd.f32 %v234_v46, %v2085_v48  ;;  %v2108_v0 = vmul.f32 %v200_v39, %v1854_v63  ;;  %v250_v4 = vmax.f32 %v248_v7, %v2079_v44 }
 0x17f   :  { %2979 = vst [vmem:[#allocation22_spill] sm:$0xff] %v2104_v29  ;;  %v1597_v59 = vpop.eup %1596  ;;  %v2111_v1 = vmul.f32 %v1869_v14, %v423_v49  ;;  %v416_v61 = vmul.f32 0.5, %v1595_v16  ;;  %v263_v56 = vmax.f32 %v261_v11, %v2085_v48  ;;  %v445_v28 = vadd.f32 %v444_v52, %v2093_v23  ;;  %v2571_v48 = vld [vmem:[%s2926_s4 + $0x168] sm:$0xff] }
 0x180   :  { %2980 = vst [vmem:[#allocation23_spill] sm:$0xff] %v2108_v0  ;;  %v2117_v10 = vmul.f32 %v1874_v17, %v423_v49  ;;  %v458_v62 = vadd.f32 %v457_v53, %v2098_v51  ;;  %v472_v37 = vmax.f32 %v470_v43, %v2093_v23  ;;  %v2122_v63 = vmul.f32 %v201_v54, %v1879_v18  ;;  %v2494_v23 = vld [vmem:[%s2926_s4 + $0x120] sm:$0xff] }
 0x181   :  { %2981 = vst [vmem:[#allocation24_spill] sm:$0xff] %v2111_v1  ;;  %v2125_v14 = vmul.f32 %v201_v54, %v1884_v19  ;;  %v485_v30 = vmax.f32 %v483_v5, %v2098_v51  ;;  %v223_v7 = vadd.f32 %v222_v27, %v2104_v29  ;;  %v424_v11 = vadd.f32 0.5, %v416_v61 }
 0x182   :  { %2982 = vst [vmem:[#allocation25_spill] sm:$0xff] %v2117_v10  ;;  %2983 = vst [vmem:[#allocation26_spill] sm:$0xff] %v2122_v63  ;;  %v194_v31 = vmul.f32 0.5, %v1597_v59  ;;  %v236_v42 = vadd.f32 %v235_v60, %v2108_v0  ;;  %v251_v17 = vmax.f32 %v249_v6, %v2104_v29  ;;  %v264_v38 = vmax.f32 %v262_v50, %v2108_v0  ;;  %v2557_v0 = vld [vmem:[%s2926_s4 + $0x160] sm:$0xff] }
 0x183   :  { %2984 = vst [vmem:[#allocation27_spill] sm:$0xff] %v2125_v14  ;;  %v446_v43 = vadd.f32 %v445_v28, %v2111_v1  ;;  %v459_v18 = vadd.f32 %v458_v62, %v2117_v10  ;;  %v2135_v39 = vmul.f32 %v1899_v32, %v424_v11  ;;  %v2138_v19 = vmul.f32 %v1904_v33, %v424_v11 }
 0x184   :  { %v202_v5 = vadd.f32 0.5, %v194_v31  ;;  %v473_v45 = vmax.f32 %v471_v55, %v2111_v1  ;;  %v486_v49 = vmax.f32 %v484_v57, %v2117_v10  ;;  %v224_v16 = vadd.f32 %v223_v7, %v2122_v63 }
 0x185   :  { %2985 = vst [vmem:[#allocation28_spill] sm:$0xff] %v2135_v39  ;;  %2986 = vst [vmem:[#allocation29_spill] sm:$0xff] %v2138_v19  ;;  %v237_v46 = vadd.f32 %v236_v42, %v2125_v14  ;;  %v447_v6 = vadd.f32 %v446_v43, %v2135_v39  ;;  %v460_v50 = vadd.f32 %v459_v18, %v2138_v19 }
 0x186   :  { %v474_v52 = vmax.f32 %v472_v37, %v2135_v39  ;;  %v487_v32 = vmax.f32 %v485_v30, %v2138_v19  ;;  %v252_v33 = vmax.f32 %v250_v4, %v2122_v63  ;;  %v265_v53 = vmax.f32 %v263_v56, %v2125_v14  ;;  %v2552_v63 = vld [vmem:[%s2926_s4 + $0x158] sm:$0xff] }
 0x187   :  { %v2151_v54 = vmul.f32 %v202_v5, %v1909_v35  ;;  %v2154_v55 = vmul.f32 %v202_v5, %v1914_v36  ;;  %v448_v57 = vrot.slane %v447_v6, 4  ;;  %v461_v27 = vrot.slane %v460_v50, 4 }
 0x188   :  { %v475_v59 = vmax.f32 %v473_v45, %v474_v52  ;;  %v488_v60 = vmax.f32 %v486_v49, %v487_v32 }
 0x189   :  { %2987 = vst [vmem:[#allocation30_spill] sm:$0xff] %v2151_v54  ;;  %2988 = vst [vmem:[#allocation31_spill] sm:$0xff] %v2154_v55  ;;  %v225_v61 = vadd.f32 %v224_v16, %v2151_v54  ;;  %v238_v28 = vadd.f32 %v237_v46, %v2154_v55  ;;  %v253_v62 = vmax.f32 %v251_v17, %v2151_v54 }
 0x18a   :  { %v266_v4 = vmax.f32 %v264_v38, %v2154_v55  ;;  %v449_v37 = vadd.f32 %v448_v57, %v447_v6  ;;  %v462_v56 = vadd.f32 %v461_v27, %v460_v50  ;;  %v476_v30 = vrot.slane %v475_v59, 4  ;;  %v2527_v55 = vld [vmem:[%s2926_s4 + $0x140] sm:$0xff] }
 0x18b   :  { %v489_v35 = vrot.slane %v488_v60, 4  ;;  %v226_v7 = vrot.slane %v225_v61, 4  ;;  %v239_v11 = vrot.slane %v238_v28, 4  ;;  %v254_v36 = vmax.f32 %v252_v33, %v253_v62 }
 0x18c   :  { %v267_v31 = vmax.f32 %v265_v53, %v266_v4  ;;  %v450_v42 = vrot.slane %v449_v37, 2  ;;  %v463_v43 = vrot.slane %v462_v56, 2  ;;  %v477_v18 = vmax.f32 %v475_v59, %v476_v30 }
 0x18d   :  { %v490_v5 = vmax.f32 %v488_v60, %v489_v35  ;;  %v227_v45 = vadd.f32 %v226_v7, %v225_v61  ;;  %v240_v49 = vadd.f32 %v239_v11, %v238_v28  ;;  %v255_v16 = vrot.slane %v254_v36, 4 }
 0x18e   :  { %v268_v46 = vrot.slane %v267_v31, 4  ;;  %v451_v52 = vadd.f32 %v450_v42, %v449_v37  ;;  %v464_v17 = vadd.f32 %v463_v43, %v462_v56  ;;  %v478_v32 = vrot.slane %v477_v18, 2 }
 0x18f   :  { %v491_v38 = vrot.slane %v490_v5, 2  ;;  %v228_v6 = vrot.slane %v227_v45, 2  ;;  %v241_v50 = vrot.slane %v240_v49, 2  ;;  %v256_v57 = vmax.f32 %v254_v36, %v255_v16 }
 0x190   :  { %v269_v27 = vmax.f32 %v267_v31, %v268_v46  ;;  %v452_v19 = vrot.slane %v451_v52, 1  ;;  %v465_v39 = vrot.slane %v464_v17, 1  ;;  %v479_v33 = vmax.f32 %v477_v18, %v478_v32 }
 0x191   :  { %v492_v53 = vmax.f32 %v490_v5, %v491_v38  ;;  %v229_v62 = vadd.f32 %v228_v6, %v227_v45  ;;  %v242_v4 = vadd.f32 %v241_v50, %v240_v49  ;;  %v257_v59 = vrot.slane %v256_v57, 2 }
 0x192   :  { %v270_v60 = vrot.slane %v269_v27, 2  ;;  %v453_v61 = vadd.f32 %v452_v19, %v451_v52  ;;  %v466_v28 = vadd.f32 %v465_v39, %v464_v17  ;;  %v480_v42 = vrot.slane %v479_v33, 1 }
 0x193   :  { %v230_v30 = vrot.slane %v229_v62, 1  ;;  %v243_v35 = vrot.slane %v242_v4, 1  ;;  %v258_v37 = vmax.f32 %v256_v57, %v257_v59  ;;  %v493_v43 = vrot.slane %v492_v53, 1 }
 0x194   :  { %v271_v56 = vmax.f32 %v269_v27, %v270_v60  ;;  %v467_v7 = vmul.f32 0.015625, %v453_v61  ;;  %v468_v11 = vmul.f32 0.015625, %v466_v28  ;;  %v481_v39 = vmax.f32 %v479_v33, %v480_v42  ;;  %v513_v42 = vld [vmem:[%s2926_s4] sm:$0xff] }
 0x195   :  { %v231_v36 = vadd.f32 %v230_v30, %v229_v62  ;;  %v244_v31 = vadd.f32 %v243_v35, %v242_v4  ;;  %v259_v16 = vrot.slane %v258_v37, 1  ;;  %v494_v19 = vmax.f32 %v492_v53, %v493_v43  ;;  %v1408_v43 = vld [vmem:[%s2926_s4 + $0x20] sm:$0xff] }
 0x196   :  { %v272_v46 = vrot.slane %v271_v56, 1  ;;  %v2930_v57 = vlaneseq }
 0x197   :  { %v246_v18 = vmul.f32 0.015625, %v231_v36  ;;  %v247_v5 = vmul.f32 0.015625, %v244_v31  ;;  %v260_v45 = vmax.f32 %v258_v37, %v259_v16  ;;  %v1405_v16 = vld [vmem:[%s2926_s4 + $0x8] sm:$0xff] }
 0x198   :  { %v273_v49 = vmax.f32 %v271_v56, %v272_v46  ;;  %v2221_v27 = vand.u32 127, %v2930_v57 }
 0x199   :  { %v496_v52 = vsel %vm495_vm1, %v246_v18, %v467_v7  ;;  %v497_v17 = vsel %vm495_vm1, %v247_v5, %v468_v11  ;;  %v515_v5 = vcombine.high %v513_v42, %v513_v42 }
 0x19a   :  { %v499_v32 = vsel %vm498_vm2, %v496_v52, %v260_v45  ;;  %v500_v38 = vsel %vm498_vm2, %v497_v17, %v273_v49  ;;  %vm510_vm4 = vcmp.lt.s32.totalorder %v2221_v27, 51  ;;  %vm525_vm5 = vcmp.lt.s32.totalorder %v2221_v27, 50  ;;  %v1409_v49 = vld [vmem:[%s2926_s4 + $0x28] sm:$0xff] }
 0x19b   :  { %v2160_v6 = vsel %vm501_vm3, %v499_v32, %v481_v39  ;;  %v2162_v50 = vsel %vm501_vm3, %v500_v38, %v494_v19  ;;  %vm541_vm6 = vcmp.lt.s32.totalorder %v2221_v27, 49  ;;  %vm557_vm7 = vcmp.lt.s32.totalorder %v2221_v27, 48  ;;  %v1406_v32 = vld [vmem:[%s2926_s4 + $0x10] sm:$0xff] }
 0x19c   :  { %506 = vrot.lane.b32.xlu1 %v2162_v50, %s1602_s3  ;;  %504 = vrot.lane.b32.xlu0 %v2160_v6, %s1602_s3  ;;  %s1631_s3 = smov 113   ;;  %vm573_vm8 = vcmp.lt.s32.totalorder %v2221_v27, 47  ;;  %v579_v45 = vcombine.high %v1408_v43, %v1408_v43  ;;  %v531_v39 = vcombine.high %v1405_v16, %v1405_v16  ;;  %vm589_vm9 = vcmp.lt.s32.totalorder %v2221_v27, 46 }
 0x19d   :  { %vm605_vm10 = vcmp.lt.s32.totalorder %v2221_v27, 45  ;;  %vm621_vm11 = vcmp.lt.s32.totalorder %v2221_v27, 35  ;;  %vm637_vm12 = vcmp.lt.s32.totalorder %v2221_v27, 34  ;;  %vm653_vm13 = vcmp.lt.s32.totalorder %v2221_v27, 33 }
 0x19e   :  { %vm669_vm14 = vcmp.lt.s32.totalorder %v2221_v27, 32  ;;  %vm685_vm15 = vcmp.lt.s32.totalorder %v2221_v27, 31  ;;  %vm701_vm0 = vcmp.lt.s32.totalorder %v2221_v27, 30  ;;  %vm717_vm1 = vcmp.lt.s32.totalorder %v2221_v27, 29 }
 0x19f   :  { %vm733_vm2 = vcmp.lt.s32.totalorder %v2221_v27, 19  ;;  %vm749_vm3 = vcmp.lt.s32.totalorder %v2221_v27, 18 }
 0x1a0   :  { %521 = vrot.lane.b32.xlu1 %v2160_v6, %s1603_s16  ;;  %537 = vrot.lane.b32.xlu0 %v2160_v6, %s1604_s17 }
 0x1a4   :  { %523 = vrot.lane.b32.xlu1 %v2162_v50, %s1603_s16  ;;  %553 = vrot.lane.b32.xlu0 %v2160_v6, %s1605_s18  ;;  %s1632_s16 = smov 112  }
 0x1a8   :  { %539 = vrot.lane.b32.xlu1 %v2162_v50, %s1604_s17  ;;  %569 = vrot.lane.b32.xlu0 %v2160_v6, %s1606_s19  ;;  %s1633_s17 = smov 111  }
 0x1ac   :  { %555 = vrot.lane.b32.xlu1 %v2162_v50, %s1605_s18  ;;  %585 = vrot.lane.b32.xlu0 %v2160_v6, %s1607_s20  ;;  %s1634_s18 = smov 110  }
 0x1b0   :  { %571 = vrot.lane.b32.xlu1 %v2162_v50, %s1606_s19  ;;  %601 = vrot.lane.b32.xlu0 %v2160_v6, %s1608_s21  ;;  %s1635_s19 = smov 109  }
 0x1b4   :  { %587 = vrot.lane.b32.xlu1 %v2162_v50, %s1607_s20  ;;  %617 = vrot.lane.b32.xlu0 %v2160_v6, %s1609_s22 }
 0x1b8   :  { %603 = vrot.lane.b32.xlu1 %v2162_v50, %s1608_s21  ;;  %633 = vrot.lane.b32.xlu0 %v2160_v6, %s1610_s23 }
 0x1bc   :  { %619 = vrot.lane.b32.xlu1 %v2162_v50, %s1609_s22  ;;  %649 = vrot.lane.b32.xlu0 %v2160_v6, %s1611_s24  ;;  %s1643_s22 = smov 83  }
 0x1c0   :  { %635 = vrot.lane.b32.xlu1 %v2162_v50, %s1610_s23  ;;  %665 = vrot.lane.b32.xlu0 %v2160_v6, %s1612_s25 }
 0x1c4   :  { %651 = vrot.lane.b32.xlu1 %v2162_v50, %s1611_s24  ;;  %681 = vrot.lane.b32.xlu0 %v2160_v6, %s1613_s26 }
 0x1c8   :  { %667 = vrot.lane.b32.xlu1 %v2162_v50, %s1612_s25  ;;  %697 = vrot.lane.b32.xlu0 %v2160_v6, %s1614_s27  ;;  %s1644_s25 = smov 82  }
 0x1cc   :  { %683 = vrot.lane.b32.xlu1 %v2162_v50, %s1613_s26  ;;  %713 = vrot.lane.b32.xlu0 %v2160_v6, %s1615_s2  ;;  %s1636_s26 = smov 99  }
 0x1d0   :  { %699 = vrot.lane.b32.xlu1 %v2162_v50, %s1614_s27  ;;  %729 = vrot.lane.b32.xlu0 %v2160_v6, %s1616_s28 }
 0x1d4   :  { %715 = vrot.lane.b32.xlu1 %v2162_v50, %s1615_s2  ;;  %745 = vrot.lane.b32.xlu0 %v2160_v6, %s1617_s29  ;;  %s1645_s2 = smov 81  }
 0x1d8   :  { %731 = vrot.lane.b32.xlu1 %v2162_v50, %s1616_s28  ;;  %761 = vrot.lane.b32.xlu0 %v2160_v6, %s1618_s30 }
 0x1dc   :  { %747 = vrot.lane.b32.xlu1 %v2162_v50, %s1617_s29  ;;  %777 = vrot.lane.b32.xlu0 %v2160_v6, %s1619_s6 }
 0x1e0   :  { %763 = vrot.lane.b32.xlu1 %v2162_v50, %s1618_s30  ;;  %793 = vrot.lane.b32.xlu0 %v2160_v6, %s1620_s7  ;;  %s1637_s30 = smov 98  }
 0x1e4   :  { %779 = vrot.lane.b32.xlu1 %v2162_v50, %s1619_s6  ;;  %809 = vrot.lane.b32.xlu0 %v2160_v6, %s1621_s8 }
 0x1e8   :  { %795 = vrot.lane.b32.xlu1 %v2162_v50, %s1620_s7  ;;  %825 = vrot.lane.b32.xlu0 %v2160_v6, %s1622_s9 }
 0x1ec   :  { %811 = vrot.lane.b32.xlu1 %v2162_v50, %s1621_s8  ;;  %841 = vrot.lane.b32.xlu0 %v2160_v6, %s1623_s10  ;;  %s1647_s8 = smov 79  }
 0x1f0   :  { %827 = vrot.lane.b32.xlu1 %v2162_v50, %s1622_s9  ;;  %857 = vrot.lane.b32.xlu0 %v2160_v6, %s1624_s11 }
 0x1f4   :  { %843 = vrot.lane.b32.xlu1 %v2162_v50, %s1623_s10  ;;  %873 = vrot.lane.b32.xlu0 %v2160_v6, %s1625_s12  ;;  %s1638_s10 = smov 97  }
 0x1f8   :  { %859 = vrot.lane.b32.xlu1 %v2162_v50, %s1624_s11  ;;  %898 = vrot.lane.b32.xlu0 %v2160_v6, %s1626_s13  ;;  %s1648_s11 = smov 78  }
 0x1fc   :  { %875 = vrot.lane.b32.xlu1 %v2162_v50, %s1625_s12  ;;  %914 = vrot.lane.b32.xlu0 %v2160_v6, %s1627_s0 }
 0x200   :  { %900 = vrot.lane.b32.xlu1 %v2162_v50, %s1626_s13  ;;  %930 = vrot.lane.b32.xlu0 %v2160_v6, %s1628_s1  ;;  %s1639_s13 = smov 96  }
 0x204   :  { %916 = vrot.lane.b32.xlu1 %v2162_v50, %s1627_s0  ;;  %946 = vrot.lane.b32.xlu0 %v2160_v6, %s1629_s14  ;;  %s1649_s0 = smov 77  }
 0x208   :  { %932 = vrot.lane.b32.xlu1 %v2162_v50, %s1628_s1  ;;  %962 = vrot.lane.b32.xlu0 %v2160_v6, %s1630_s15 }
 0x20c   :  { %948 = vrot.lane.b32.xlu1 %v2162_v50, %s1629_s14  ;;  %978 = vrot.lane.b32.xlu0 %v2160_v6, %s1631_s3  ;;  %s1640_s14 = smov 95  }
 0x20e   :  { %v507_v33 = vpop.permute.xlu1 %506  ;;  %v505_v53 = vpop.permute.xlu0 %504 }
 0x20f   :  { %v511_v62 = vsel %vm510_vm4, %v505_v53, %v507_v33  ;;  %v512_v4 = vsel %vm510_vm4, %v507_v33, %v505_v53  ;;  %v595_v53 = vcombine.high %v1409_v49, %v1409_v49  ;;  %vm765_vm4 = vcmp.lt.s32.totalorder %v2221_v27, 17 }
 0x210   :  { %964 = vrot.lane.b32.xlu1 %v2162_v50, %s1630_s15  ;;  %994 = vrot.lane.b32.xlu0 %v2160_v6, %s1632_s16  ;;  %v517_v17 = vmul.f32 %v513_v42, %v512_v4  ;;  %v1410_v4 = vld [vmem:[%s2926_s4 + $0x30] sm:$0xff] }
 0x212   :  { %v522_v59 = vpop.permute.xlu1 %521  ;;  %v538_v60 = vpop.permute.xlu0 %537 }
 0x214   :  { %980 = vrot.lane.b32.xlu1 %v2162_v50, %s1631_s3  ;;  %1010 = vrot.lane.b32.xlu0 %v2160_v6, %s1633_s17 }
 0x216   :  { %v524_v61 = vpop.permute.xlu1 %523  ;;  %v554_v28 = vpop.permute.xlu0 %553 }
 0x217   :  { %v526_v30 = vsel %vm525_vm5, %v522_v59, %v524_v61  ;;  %v527_v35 = vsel %vm525_vm5, %v524_v61, %v522_v59  ;;  %v518_v59 = vmul.f32 %v515_v5, %v511_v62  ;;  %vm781_vm5 = vcmp.lt.s32.totalorder %v2221_v27, 16 }
 0x218   :  { %996 = vrot.lane.b32.xlu1 %v2162_v50, %s1632_s16  ;;  %1026 = vrot.lane.b32.xlu0 %v2160_v6, %s1634_s18  ;;  %s1641_s16 = smov 94  }
 0x21a   :  { %v540_v37 = vpop.permute.xlu1 %539  ;;  %v570_v56 = vpop.permute.xlu0 %569 }
 0x21b   :  { %v2234_v7 = vsel %vm541_vm6, %v538_v60, %v540_v37  ;;  %v543_v11 = vsel %vm541_vm6, %v540_v37, %v538_v60  ;;  %vm797_vm6 = vcmp.lt.s32.totalorder %v2221_v27, 15 }
 0x21c   :  { %1012 = vrot.lane.b32.xlu1 %v2162_v50, %s1633_s17  ;;  %1042 = vrot.lane.b32.xlu0 %v2160_v6, %s1635_s19 }
 0x21e   :  { %v556_v36 = vpop.permute.xlu1 %555  ;;  %v586_v31 = vpop.permute.xlu0 %585 }
 0x21f   :  { %v2248_v46 = vsel %vm557_vm7, %v554_v28, %v556_v36  ;;  %v2250_v18 = vsel %vm557_vm7, %v556_v36, %v554_v28  ;;  %v547_v28 = vcombine.high %v1406_v32, %v1406_v32  ;;  %v1407_v36 = vld [vmem:[%s2926_s4 + $0x18] sm:$0xff]  ;;  %vm813_vm7 = vcmp.lt.s32.totalorder %v2221_v27, 14 }
 0x220   :  { %1028 = vrot.lane.b32.xlu1 %v2162_v50, %s1634_s18  ;;  %1058 = vrot.lane.b32.xlu0 %v2160_v6, %s1636_s26 }
 0x222   :  { %v572_v19 = vpop.permute.xlu1 %571  ;;  %v602_v52 = vpop.permute.xlu0 %601 }
 0x223   :  { %v574_v38 = vsel %vm573_vm8, %v570_v56, %v572_v19  ;;  %v575_v33 = vsel %vm573_vm8, %v572_v19, %v570_v56  ;;  %v611_v19 = vcombine.high %v1410_v4, %v1410_v4  ;;  %vm829_vm8 = vcmp.lt.s32.totalorder %v2221_v27, 13 }
 0x224   :  { %v581_v60 = vmul.f32 %v1408_v43, %v575_v33  ;;  %v582_v61 = vmul.f32 %v579_v45, %v574_v38  ;;  %1044 = vrot.lane.b32.xlu1 %v2162_v50, %s1635_s19  ;;  %1074 = vrot.lane.b32.xlu0 %v2160_v6, %s1637_s30  ;;  %v533_v43 = vmul.f32 %v1405_v16, %v527_v35  ;;  %v1411_v35 = vld [vmem:[%s2926_s4 + $0x38] sm:$0xff]  ;;  %s1642_s19 = smov 93  }
 0x225   :  { %v534_v38 = vmul.f32 %v531_v39, %v526_v30  ;;  %v563_v16 = vcombine.high %v1407_v36, %v1407_v36 }
 0x226   :  { %v2269_v37 = vadd.f32 %v581_v60, %v517_v17  ;;  %v2271_v56 = vadd.f32 %v582_v61, %v518_v59  ;;  %v588_v62 = vpop.permute.xlu1 %587  ;;  %v618_v42 = vpop.permute.xlu0 %617  ;;  %v627_v60 = vcombine.high %v1411_v35, %v1411_v35  ;;  %v550_v61 = vmul.f32 %v547_v28, %v2234_v7 }
 0x227   :  { %v590_v5 = vsel %vm589_vm9, %v586_v31, %v588_v62  ;;  %v591_v45 = vsel %vm589_vm9, %v588_v62, %v586_v31  ;;  %v565_v7 = vmul.f32 %v1407_v36, %v2250_v18  ;;  %vm845_vm9 = vcmp.lt.s32.totalorder %v2221_v27, 3 }
 0x228   :  { %v597_v33 = vmul.f32 %v1409_v49, %v591_v45  ;;  %v598_v57 = vmul.f32 %v595_v53, %v590_v5  ;;  %1060 = vrot.lane.b32.xlu1 %v2162_v50, %s1636_s26  ;;  %1090 = vrot.lane.b32.xlu0 %v2160_v6, %s1638_s10  ;;  %v549_v49 = vmul.f32 %v1406_v32, %v543_v11 }
 0x22a   :  { %v599_v17 = vadd.f32 %v597_v33, %v533_v43  ;;  %v600_v31 = vadd.f32 %v598_v57, %v534_v38  ;;  %v604_v59 = vpop.permute.xlu1 %603  ;;  %v634_v30 = vpop.permute.xlu0 %633  ;;  %v1412_v57 = vld [vmem:[%s2926_s4 + $0x40] sm:$0xff] }
 0x22b   :  { %v606_v39 = vsel %vm605_vm10, %v602_v52, %v604_v59  ;;  %v607_v53 = vsel %vm605_vm10, %v604_v59, %v602_v52  ;;  %v643_v45 = vcombine.high %v1412_v57, %v1412_v57  ;;  %v1413_v59 = vld [vmem:[%s2926_s4 + $0x48] sm:$0xff]  ;;  %vm861_vm10 = vcmp.lt.s32.totalorder %v2221_v27, 2 }
 0x22c   :  { %v613_v62 = vmul.f32 %v1410_v4, %v607_v53  ;;  %v614_v5 = vmul.f32 %v611_v19, %v606_v39  ;;  %1076 = vrot.lane.b32.xlu1 %v2162_v50, %s1637_s30  ;;  %1106 = vrot.lane.b32.xlu0 %v2160_v6, %s1639_s13  ;;  %v566_v19 = vmul.f32 %v563_v16, %v2248_v46  ;;  %s1646_s30 = smov 80  }
 0x22d   :  { %v659_v53 = vcombine.high %v1413_v59, %v1413_v59 }
 0x22e   :  { %v615_v11 = vadd.f32 %v613_v62, %v549_v49  ;;  %v616_v32 = vadd.f32 %v614_v5, %v550_v61  ;;  %v620_v52 = vpop.permute.xlu1 %619  ;;  %v650_v43 = vpop.permute.xlu0 %649 }
 0x22f   :  { %v622_v4 = vsel %vm621_vm11, %v618_v42, %v620_v52  ;;  %v623_v28 = vsel %vm621_vm11, %v620_v52, %v618_v42  ;;  %vm877_vm11 = vcmp.lt.s32.totalorder %v2221_v27, 1 }
 0x230   :  { %v629_v38 = vmul.f32 %v1411_v35, %v623_v28  ;;  %v630_v33 = vmul.f32 %v627_v60, %v622_v4  ;;  %1092 = vrot.lane.b32.xlu1 %v2162_v50, %s1638_s10  ;;  %1122 = vrot.lane.b32.xlu0 %v2160_v6, %s1640_s14  ;;  %v1414_v60 = vld [vmem:[%s2926_s4 + $0x50] sm:$0xff] }
 0x231   :  { %v675_v28 = vcombine.high %v1414_v60, %v1414_v60 }
 0x232   :  { %v631_v18 = vadd.f32 %v629_v38, %v565_v7  ;;  %v632_v36 = vadd.f32 %v630_v33, %v566_v19  ;;  %v636_v42 = vpop.permute.xlu1 %635  ;;  %v666_v49 = vpop.permute.xlu0 %665 }
 0x233   :  { %v638_v39 = vsel %vm637_vm12, %v634_v30, %v636_v42  ;;  %v639_v46 = vsel %vm637_vm12, %v636_v42, %v634_v30  ;;  %vm902_vm12 = vcmp.lt.s32.totalorder %v2221_v27, 127 }
 0x234   :  { %v645_v35 = vmul.f32 %v1412_v57, %v639_v46  ;;  %v646_v16 = vmul.f32 %v643_v45, %v638_v39  ;;  %1108 = vrot.lane.b32.xlu1 %v2162_v50, %s1639_s13  ;;  %1138 = vrot.lane.b32.xlu0 %v2160_v6, %s1641_s16  ;;  %v1416_v46 = vld [vmem:[%s2926_s4 + $0x60] sm:$0xff] }
 0x236   :  { %v647_v61 = vadd.f32 %v645_v35, %v2269_v37  ;;  %v648_v62 = vadd.f32 %v646_v16, %v2271_v56  ;;  %v652_v5 = vpop.permute.xlu1 %651  ;;  %v682_v30 = vpop.permute.xlu0 %681  ;;  %v1415_v37 = vld [vmem:[%s2926_s4 + $0x58] sm:$0xff] }
 0x237   :  { %v654_v57 = vsel %vm653_vm13, %v650_v43, %v652_v5  ;;  %v655_v52 = vsel %vm653_vm13, %v652_v5, %v650_v43  ;;  %v691_v39 = vcombine.high %v1415_v37, %v1415_v37  ;;  %vm918_vm13 = vcmp.lt.s32.totalorder %v2221_v27, 126 }
 0x238   :  { %v661_v7 = vmul.f32 %v1413_v59, %v655_v52  ;;  %v662_v4 = vmul.f32 %v659_v53, %v654_v57  ;;  %1124 = vrot.lane.b32.xlu1 %v2162_v50, %s1640_s14  ;;  %1154 = vrot.lane.b32.xlu0 %v2160_v6, %s1642_s19  ;;  %v707_v57 = vcombine.high %v1416_v46, %v1416_v46  ;;  %v1417_v52 = vld [vmem:[%s2926_s4 + $0x68] sm:$0xff] }
 0x23a   :  { %v663_v45 = vadd.f32 %v661_v7, %v599_v17  ;;  %v664_v56 = vadd.f32 %v662_v4, %v600_v31  ;;  %v668_v19 = vpop.permute.xlu1 %667  ;;  %v698_v38 = vpop.permute.xlu0 %697 }
 0x23b   :  { %v670_v33 = vsel %vm669_vm14, %v666_v49, %v668_v19  ;;  %v671_v43 = vsel %vm669_vm14, %v668_v19, %v666_v49  ;;  %vm934_vm14 = vcmp.lt.s32.totalorder %v2221_v27, 125 }
 0x23c   :  { %v677_v59 = vmul.f32 %v1414_v60, %v671_v43  ;;  %v678_v42 = vmul.f32 %v675_v28, %v670_v33  ;;  %1140 = vrot.lane.b32.xlu1 %v2162_v50, %s1641_s16  ;;  %1170 = vrot.lane.b32.xlu0 %v2160_v6, %s1643_s22  ;;  %v723_v33 = vcombine.high %v1417_v52, %v1417_v52  ;;  %v1418_v43 = vld [vmem:[%s2926_s4 + $0x70] sm:$0xff] }
 0x23e   :  { %v679_v17 = vadd.f32 %v677_v59, %v615_v11  ;;  %v680_v31 = vadd.f32 %v678_v42, %v616_v32  ;;  %v684_v35 = vpop.permute.xlu1 %683  ;;  %v714_v16 = vpop.permute.xlu0 %713 }
 0x23f   :  { %v686_v53 = vsel %vm685_vm15, %v682_v30, %v684_v35  ;;  %v687_v49 = vsel %vm685_vm15, %v684_v35, %v682_v30  ;;  %vm950_vm15 = vcmp.lt.s32.totalorder %v2221_v27, 115 }
 0x240   :  { %v693_v60 = vmul.f32 %v1415_v37, %v687_v49  ;;  %v694_v5 = vmul.f32 %v691_v39, %v686_v53  ;;  %1156 = vrot.lane.b32.xlu1 %v2162_v50, %s1642_s19  ;;  %1186 = vrot.lane.b32.xlu0 %v2160_v6, %s1644_s25  ;;  %v739_v53 = vcombine.high %v1418_v43, %v1418_v43  ;;  %v1419_v49 = vld [vmem:[%s2926_s4 + $0x78] sm:$0xff] }
 0x242   :  { %v695_v11 = vadd.f32 %v693_v60, %v631_v18  ;;  %v696_v32 = vadd.f32 %v694_v5, %v632_v36  ;;  %v700_v7 = vpop.permute.xlu1 %699  ;;  %v730_v4 = vpop.permute.xlu0 %729 }
 0x243   :  { %v702_v28 = vsel %vm701_vm0, %v698_v38, %v700_v7  ;;  %v703_v30 = vsel %vm701_vm0, %v700_v7, %v698_v38  ;;  %vm966_vm0 = vcmp.lt.s32.totalorder %v2221_v27, 114 }
 0x244   :  { %v709_v37 = vmul.f32 %v1416_v46, %v703_v30  ;;  %v710_v19 = vmul.f32 %v707_v57, %v702_v28  ;;  %1172 = vrot.lane.b32.xlu1 %v2162_v50, %s1643_s22  ;;  %1202 = vrot.lane.b32.xlu0 %v2160_v6, %s1645_s2  ;;  %v755_v28 = vcombine.high %v1419_v49, %v1419_v49  ;;  %v1420_v30 = vld [vmem:[%s2926_s4 + $0x80] sm:$0xff] }
 0x246   :  { %v711_v18 = vadd.f32 %v709_v37, %v647_v61  ;;  %v712_v36 = vadd.f32 %v710_v19, %v648_v62  ;;  %v716_v59 = vpop.permute.xlu1 %715  ;;  %v746_v42 = vpop.permute.xlu0 %745 }
 0x247   :  { %v718_v39 = vsel %vm717_vm1, %v714_v16, %v716_v59  ;;  %v719_v38 = vsel %vm717_vm1, %v716_v59, %v714_v16  ;;  %vm982_vm1 = vcmp.lt.s32.totalorder %v2221_v27, 113 }
 0x248   :  { %v725_v46 = vmul.f32 %v1417_v52, %v719_v38  ;;  %v726_v35 = vmul.f32 %v723_v33, %v718_v39  ;;  %1188 = vrot.lane.b32.xlu1 %v2162_v50, %s1644_s25  ;;  %1218 = vrot.lane.b32.xlu0 %v2160_v6, %s1646_s30  ;;  %v771_v39 = vcombine.high %v1420_v30, %v1420_v30  ;;  %v1421_v38 = vld [vmem:[%s2926_s4 + $0x88] sm:$0xff] }
 0x24a   :  { %v727_v61 = vadd.f32 %v725_v46, %v663_v45  ;;  %v728_v62 = vadd.f32 %v726_v35, %v664_v56  ;;  %v732_v60 = vpop.permute.xlu1 %731  ;;  %v762_v5 = vpop.permute.xlu0 %761 }
 0x24b   :  { %v734_v57 = vsel %vm733_vm2, %v730_v4, %v732_v60  ;;  %v735_v16 = vsel %vm733_vm2, %v732_v60, %v730_v4  ;;  %vm998_vm2 = vcmp.lt.s32.totalorder %v2221_v27, 112 }
 0x24c   :  { %v741_v52 = vmul.f32 %v1418_v43, %v735_v16  ;;  %v742_v7 = vmul.f32 %v739_v53, %v734_v57  ;;  %1204 = vrot.lane.b32.xlu1 %v2162_v50, %s1645_s2  ;;  %1234 = vrot.lane.b32.xlu0 %v2160_v6, %s1647_s8  ;;  %v787_v57 = vcombine.high %v1421_v38, %v1421_v38  ;;  %v1422_v16 = vld [vmem:[%s2926_s4 + $0x90] sm:$0xff] }
 0x24e   :  { %v743_v45 = vadd.f32 %v741_v52, %v679_v17  ;;  %v744_v56 = vadd.f32 %v742_v7, %v680_v31  ;;  %v748_v37 = vpop.permute.xlu1 %747  ;;  %v778_v19 = vpop.permute.xlu0 %777 }
 0x24f   :  { %v750_v33 = vsel %vm749_vm3, %v746_v42, %v748_v37  ;;  %v751_v4 = vsel %vm749_vm3, %v748_v37, %v746_v42  ;;  %vm1014_vm3 = vcmp.lt.s32.totalorder %v2221_v27, 111 }
 0x250   :  { %v757_v43 = vmul.f32 %v1419_v49, %v751_v4  ;;  %v758_v59 = vmul.f32 %v755_v28, %v750_v33  ;;  %1220 = vrot.lane.b32.xlu1 %v2162_v50, %s1646_s30  ;;  %1250 = vrot.lane.b32.xlu0 %v2160_v6, %s1648_s11  ;;  %v803_v33 = vcombine.high %v1422_v16, %v1422_v16  ;;  %v1423_v4 = vld [vmem:[%s2926_s4 + $0x98] sm:$0xff] }
 0x252   :  { %v759_v17 = vadd.f32 %v757_v43, %v695_v11  ;;  %v760_v31 = vadd.f32 %v758_v59, %v696_v32  ;;  %v764_v46 = vpop.permute.xlu1 %763  ;;  %v794_v35 = vpop.permute.xlu0 %793 }
 0x253   :  { %v766_v53 = vsel %vm765_vm4, %v762_v5, %v764_v46  ;;  %v767_v42 = vsel %vm765_vm4, %v764_v46, %v762_v5  ;;  %vm1030_vm4 = vcmp.lt.s32.totalorder %v2221_v27, 110 }
 0x254   :  { %v773_v49 = vmul.f32 %v1420_v30, %v767_v42  ;;  %v774_v60 = vmul.f32 %v771_v39, %v766_v53  ;;  %1236 = vrot.lane.b32.xlu1 %v2162_v50, %s1647_s8  ;;  %1266 = vrot.lane.b32.xlu0 %v2160_v6, %s1649_s0 }
 0x256   :  { %v775_v11 = vadd.f32 %v773_v49, %v711_v18  ;;  %v776_v32 = vadd.f32 %v774_v60, %v712_v36  ;;  %v780_v52 = vpop.permute.xlu1 %779  ;;  %v810_v7 = vpop.permute.xlu0 %809 }
 0x257   :  { %v782_v28 = vsel %vm781_vm5, %v778_v19, %v780_v52  ;;  %v783_v5 = vsel %vm781_vm5, %v780_v52, %v778_v19  ;;  %v819_v19 = vcombine.high %v1423_v4, %v1423_v4  ;;  %vm1046_vm5 = vcmp.lt.s32.totalorder %v2221_v27, 109 }
 0x258   :  { %v789_v30 = vmul.f32 %v1421_v38, %v783_v5  ;;  %v790_v37 = vmul.f32 %v787_v57, %v782_v28  ;;  %1252 = vrot.lane.b32.xlu1 %v2162_v50, %s1648_s11  ;;  %v1424_v38 = vld [vmem:[%s2926_s4 + $0xa0] sm:$0xff] }
 0x25a   :  { %v791_v43 = vadd.f32 %v789_v30, %v727_v61  ;;  %v792_v59 = vadd.f32 %v790_v37, %v728_v62  ;;  %v796_v39 = vpop.permute.xlu1 %795  ;;  %v826_v18 = vpop.permute.xlu0 %825 }
 0x25b   :  { %v798_v36 = vsel %vm797_vm6, %v794_v35, %v796_v39  ;;  %v799_v46 = vsel %vm797_vm6, %v796_v39, %v794_v35  ;;  %v835_v35 = vcombine.high %v1424_v38, %v1424_v38  ;;  %vm1062_vm6 = vcmp.lt.s32.totalorder %v2221_v27, 99 }
 0x25c   :  { %v805_v53 = vmul.f32 %v1422_v16, %v799_v46  ;;  %v806_v42 = vmul.f32 %v803_v33, %v798_v36  ;;  %1268 = vrot.lane.b32.xlu1 %v2162_v50, %s1649_s0  ;;  %v1425_v16 = vld [vmem:[%s2926_s4 + $0xa8] sm:$0xff] }
 0x25e   :  { %v807_v49 = vadd.f32 %v805_v53, %v743_v45  ;;  %v808_v60 = vadd.f32 %v806_v42, %v744_v56  ;;  %v812_v57 = vpop.permute.xlu1 %811  ;;  %v842_v61 = vpop.permute.xlu0 %841 }
 0x25f   :  { %v814_v62 = vsel %vm813_vm7, %v810_v7, %v812_v57  ;;  %v815_v52 = vsel %vm813_vm7, %v812_v57, %v810_v7  ;;  %v851_v7 = vcombine.high %v1425_v16, %v1425_v16  ;;  %vm1078_vm7 = vcmp.lt.s32.totalorder %v2221_v27, 98 }
 0x260   :  { %v821_v28 = vmul.f32 %v1423_v4, %v815_v52  ;;  %v822_v5 = vmul.f32 %v819_v19, %v814_v62  ;;  %v1426_v4 = vld [vmem:[%s2926_s4 + $0xb0] sm:$0xff] }
 0x262   :  { %v823_v30 = vadd.f32 %v821_v28, %v759_v17  ;;  %v824_v37 = vadd.f32 %v822_v5, %v760_v31  ;;  %v828_v33 = vpop.permute.xlu1 %827  ;;  %v858_v39 = vpop.permute.xlu0 %857 }
 0x263   :  { %v830_v36 = vsel %vm829_vm8, %v826_v18, %v828_v33  ;;  %v831_v45 = vsel %vm829_vm8, %v828_v33, %v826_v18  ;;  %v867_v18 = vcombine.high %v1426_v4, %v1426_v4  ;;  %vm1094_vm8 = vcmp.lt.s32.totalorder %v2221_v27, 97 }
 0x264   :  { %v837_v56 = vmul.f32 %v1424_v38, %v831_v45  ;;  %v838_v46 = vmul.f32 %v835_v35, %v830_v36  ;;  %v1427_v38 = vld [vmem:[%s2926_s4 + $0xb8] sm:$0xff] }
 0x266   :  { %v2375_v53 = vadd.f32 %v837_v56, %v775_v11  ;;  %v2377_v42 = vadd.f32 %v838_v46, %v776_v32  ;;  %v844_v19 = vpop.permute.xlu1 %843  ;;  %v874_v17 = vpop.permute.xlu0 %873 }
 0x267   :  { %v846_v31 = vsel %vm845_vm9, %v842_v61, %v844_v19  ;;  %v847_v57 = vsel %vm845_vm9, %v844_v19, %v842_v61  ;;  %v883_v61 = vcombine.high %v1427_v38, %v1427_v38  ;;  %vm1110_vm9 = vcmp.lt.s32.totalorder %v2221_v27, 96 }
 0x268   :  { %v853_v62 = vmul.f32 %v1425_v16, %v847_v57  ;;  %v854_v52 = vmul.f32 %v851_v7, %v846_v31  ;;  %v1429_v16 = vld [vmem:[%s2926_s4 + $0xc8] sm:$0xff] }
 0x26a   :  { %v855_v28 = vadd.f32 %v853_v62, %v791_v43  ;;  %v856_v5 = vadd.f32 %v854_v52, %v792_v59  ;;  %v860_v35 = vpop.permute.xlu1 %859  ;;  %v899_v11 = vpop.permute.xlu0 %898 }
 0x26b   :  { %v862_v33 = vsel %vm861_vm10, %v858_v39, %v860_v35  ;;  %v863_v32 = vsel %vm861_vm10, %v860_v35, %v858_v39  ;;  %v908_v39 = vcombine.high %v1429_v16, %v1429_v16  ;;  %vm1126_vm10 = vcmp.lt.s32.totalorder %v2221_v27, 95 }
 0x26c   :  { %v869_v36 = vmul.f32 %v1426_v4, %v863_v32  ;;  %v870_v45 = vmul.f32 %v867_v18, %v862_v33  ;;  %v1430_v4 = vld [vmem:[%s2926_s4 + $0xd0] sm:$0xff] }
 0x26e   :  { %v871_v56 = vadd.f32 %v869_v36, %v807_v49  ;;  %v872_v46 = vadd.f32 %v870_v45, %v808_v60  ;;  %v876_v7 = vpop.permute.xlu1 %875  ;;  %v915_v19 = vpop.permute.xlu0 %914 }
 0x26f   :  { %v878_v31 = vsel %vm877_vm11, %v874_v17, %v876_v7  ;;  %v879_v43 = vsel %vm877_vm11, %v876_v7, %v874_v17  ;;  %v924_v17 = vcombine.high %v1430_v4, %v1430_v4  ;;  %vm1142_vm11 = vcmp.lt.s32.totalorder %v2221_v27, 94 }
 0x270   :  { %v885_v59 = vmul.f32 %v1427_v38, %v879_v43  ;;  %v886_v57 = vmul.f32 %v883_v61, %v878_v31  ;;  %v1431_v38 = vld [vmem:[%s2926_s4 + $0xd8] sm:$0xff] }
 0x271   :  { %v940_v43 = vcombine.high %v1431_v38, %v1431_v38 }
 0x272   :  { %v887_v62 = vadd.f32 %v885_v59, %v823_v30  ;;  %v888_v52 = vadd.f32 %v886_v57, %v824_v37  ;;  %v901_v18 = vpop.permute.xlu1 %900  ;;  %v931_v35 = vpop.permute.xlu0 %930  ;;  %v1428_v37 = vld [vmem:[%s2926_s4 + $0xc0] sm:$0xff] }
 0x273   :  { %v903_v33 = vsel %vm902_vm12, %v899_v11, %v901_v18  ;;  %v904_v49 = vsel %vm902_vm12, %v901_v18, %v899_v11  ;;  %v1432_v59 = vld [vmem:[%s2926_s4 + $0xe0] sm:$0xff]  ;;  %v892_v18 = vcombine.high %v1428_v37, %v1428_v37  ;;  %vm1174_vm12 = vcmp.lt.s32.totalorder %v2221_v27, 83 }
 0x274   :  { %v910_v60 = vmul.f32 %v1429_v16, %v903_v33  ;;  %v911_v32 = vmul.f32 %v908_v39, %v904_v49 }
 0x276   :  { %v912_v36 = vadd.f32 %v910_v60, %v855_v28  ;;  %v913_v45 = vadd.f32 %v911_v32, %v856_v5  ;;  %v917_v61 = vpop.permute.xlu1 %916  ;;  %v947_v7 = vpop.permute.xlu0 %946  ;;  %v1433_v32 = vld [vmem:[%s2926_s4 + $0xe8] sm:$0xff] }
 0x277   :  { %v919_v31 = vsel %vm918_vm13, %v915_v19, %v917_v61  ;;  %v920_v30 = vsel %vm918_vm13, %v917_v61, %v915_v19  ;;  %vm1190_vm13 = vcmp.lt.s32.totalorder %v2221_v27, 82 }
 0x278   :  { %v926_v11 = vmul.f32 %v1430_v4, %v919_v31  ;;  %v927_v16 = vmul.f32 %v924_v17, %v920_v30  ;;  %v956_v4 = vcombine.high %v1432_v59, %v1432_v59  ;;  %v894_v31 = vmul.f32 %v1428_v37, %v2160_v6 }
 0x27a   :  { %v928_v57 = vadd.f32 %v926_v11, %v871_v56  ;;  %v929_v28 = vadd.f32 %v927_v16, %v872_v46  ;;  %v933_v5 = vpop.permute.xlu1 %932  ;;  %v963_v39 = vpop.permute.xlu0 %962  ;;  %v895_v56 = vmul.f32 %v892_v18, %v2162_v50  ;;  %v972_v11 = vcombine.high %v1433_v32, %v1433_v32 }
 0x27b   :  { %v935_v33 = vsel %vm934_vm14, %v931_v35, %v933_v5  ;;  %v936_v19 = vsel %vm934_vm14, %v933_v5, %v931_v35  ;;  %v896_v16 = vadd.f32 %v894_v31, %v2375_v53  ;;  %vm1158_vm14 = vcmp.lt.s32.totalorder %v2221_v27, 93 }
 0x27c   :  { %v942_v49 = vmul.f32 %v1431_v38, %v935_v33  ;;  %v943_v60 = vmul.f32 %v940_v43, %v936_v19  ;;  %v897_v43 = vadd.f32 %v895_v56, %v2377_v42 }
 0x27e   :  { %v2406_v17 = vadd.f32 %v942_v49, %v887_v62  ;;  %v2408_v61 = vadd.f32 %v943_v60, %v888_v52  ;;  %v949_v46 = vpop.permute.xlu1 %948  ;;  %v979_v30 = vpop.permute.xlu0 %978  ;;  %v1434_v52 = vld [vmem:[%s2926_s4 + $0xf0] sm:$0xff] }
 0x27f   :  { %v951_v35 = vsel %vm950_vm15, %v947_v7, %v949_v46  ;;  %v952_v38 = vsel %vm950_vm15, %v949_v46, %v947_v7  ;;  %v988_v53 = vcombine.high %v1434_v52, %v1434_v52  ;;  %vm1238_vm15 = vcmp.lt.s32.totalorder %v2221_v27, 79 }
 0x280   :  { %v958_v5 = vmul.f32 %v1432_v59, %v951_v35  ;;  %v959_v62 = vmul.f32 %v956_v4, %v952_v38 }
 0x282   :  { %v2418_v50 = vadd.f32 %v958_v5, %v896_v16  ;;  %v2420_v18 = vadd.f32 %v959_v62, %v897_v43  ;;  %v965_v6 = vpop.permute.xlu1 %964  ;;  %v995_v37 = vpop.permute.xlu0 %994 }
 0x283   :  { %v967_v7 = vsel %vm966_vm0, %v963_v39, %v965_v6  ;;  %v968_v33 = vsel %vm966_vm0, %v965_v6, %v963_v39  ;;  %vm1206_vm0 = vcmp.lt.s32.totalorder %v2221_v27, 81 }
 0x284   :  { %v974_v19 = vmul.f32 %v1433_v32, %v967_v7  ;;  %v975_v49 = vmul.f32 %v972_v11, %v968_v33 }
 0x286   :  { %v2423_v42 = vadd.f32 %v974_v19, %v912_v36  ;;  %v2425_v59 = vadd.f32 %v975_v49, %v913_v45  ;;  %v981_v60 = vpop.permute.xlu1 %980  ;;  %v2427_v4 = vpop.permute.xlu0 %1010 }
 0x287   :  { %v983_v56 = vsel %vm982_vm1, %v979_v30, %v981_v60  ;;  %v984_v46 = vsel %vm982_vm1, %v981_v60, %v979_v30  ;;  %v1435_v60 = vld [vmem:[%s2926_s4 + $0xf8] sm:$0xff]  ;;  %vm1222_vm1 = vcmp.lt.s32.totalorder %v2221_v27, 80 }
 0x288   :  { %v990_v31 = vmul.f32 %v1434_v52, %v983_v56  ;;  %v991_v35 = vmul.f32 %v988_v53, %v984_v46  ;;  %v1436_v56 = vld [vmem:[%s2926_s4 + $0x100] sm:$0xff]  ;;  %v2474_v46 = vld [vmem:[%s2926_s4 + $0x108] sm:$0xff]  ;;  %v1004_v51 = vcombine.high %v1435_v60, %v1435_v60 }
 0x289   :  { %v1020_v40 = vcombine.high %v1436_v56, %v1436_v56  ;;  %v1036_v12 = vcombine.high %v2474_v46, %v2474_v46 }
 0x28a   :  { %v2429_v38 = vadd.f32 %v990_v31, %v928_v57  ;;  %v2431_v16 = vadd.f32 %v991_v35, %v929_v28  ;;  %v997_v39 = vpop.permute.xlu1 %996  ;;  %v2433_v32 = vpop.permute.xlu0 %1026  ;;  %v2479_v31 = vld [vmem:[%s2926_s4 + $0x110] sm:$0xff]  ;;  %v2484_v35 = vld [vmem:[%s2926_s4 + $0x118] sm:$0xff] }
 0x28b   :  { %v1052_v3 = vcombine.high %v2479_v31, %v2479_v31  ;;  %v999_v9 = vsel %vm998_vm2, %v995_v37, %v997_v39  ;;  %v1000_v22 = vsel %vm998_vm2, %v997_v39, %v995_v37  ;;  %vm1254_vm2 = vcmp.lt.s32.totalorder %v2221_v27, 78 }
 0x28c   :  { %v1006_v44 = vmul.f32 %v1435_v60, %v999_v9  ;;  %v1007_v24 = vmul.f32 %v1004_v51, %v1000_v22  ;;  %v2589_v9 = vld [vmem:[%s2926_s4 + $0x180] sm:$0xff]  ;;  %v1180_v51 = vcombine.high %v2547_v21, %v2547_v21 }
 0x28e   :  { %v1013_v11 = vpop.permute.xlu1 %1012  ;;  %v2435_v43 = vpop.permute.xlu0 %1042 }
 0x28f   :  { %v1015_v37 = vsel %vm1014_vm3, %v2427_v4, %v1013_v11  ;;  %v1016_v39 = vsel %vm1014_vm3, %v1013_v11, %v2427_v4  ;;  %v2579_v4 = vld [vmem:[%s2926_s4 + $0x170] sm:$0xff]  ;;  %v2584_v11 = vld [vmem:[%s2926_s4 + $0x178] sm:$0xff]  ;;  %vm1270_vm3 = vcmp.lt.s32.totalorder %v2221_v27, 77 }
 0x290   :  { %v1022_v13 = vmul.f32 %v1436_v56, %v1015_v37  ;;  %v1023_v34 = vmul.f32 %v1020_v40, %v1016_v39  ;;  %v1244_v41 = vcombine.high %v2579_v4, %v2579_v4  ;;  %v1276_v56 = vcombine.high %v2589_v9, %v2589_v9 }
 0x291   :  { %v1008_v37 = vadd.f32 %v1006_v44, %v2406_v17  ;;  %v1009_v39 = vadd.f32 %v1007_v24, %v2408_v61 }
 0x292   :  { %v2437_v36 = vpop.permute.xlu1 %1028  ;;  %v2439_v45 = vpop.permute.xlu0 %1058  ;;  %v1024_v61 = vadd.f32 %v1022_v13, %v2418_v50 }
 0x293   :  { %v1031_v47 = vsel %vm1030_vm4, %v2433_v32, %v2437_v36  ;;  %v1032_v22 = vsel %vm1030_vm4, %v2437_v36, %v2433_v32 }
 0x294   :  { %v1038_v29 = vmul.f32 %v2474_v46, %v1031_v47  ;;  %v1039_v40 = vmul.f32 %v1036_v12, %v1032_v22 }
 0x296   :  { %v2441_v5 = vpop.permute.xlu1 %1044  ;;  %v2443_v62 = vpop.permute.xlu0 %1074 }
 0x297   :  { %v1047_v32 = vsel %vm1046_vm5, %v2435_v43, %v2441_v5  ;;  %v1048_v36 = vsel %vm1046_vm5, %v2441_v5, %v2435_v43  ;;  %v1025_v43 = vadd.f32 %v1023_v34, %v2420_v18 }
 0x298   :  { %v1055_v5 = vmul.f32 %v1052_v3, %v1048_v36  ;;  %v2991_v36 = vcombine.high %v2503_v58, %v2503_v58 }
 0x29a   :  { %v2445_v30 = vpop.permute.xlu1 %1060  ;;  %v2447_v57 = vpop.permute.xlu0 %1090 }
 0x29b   :  { %v1063_v44 = vsel %vm1062_vm6, %v2439_v45, %v2445_v30  ;;  %v1064_v24 = vsel %vm1062_vm6, %v2445_v30, %v2439_v45  ;;  %v1054_v45 = vmul.f32 %v2479_v31, %v1047_v32  ;;  %v2990_v31 = vcombine.high %v2494_v23, %v2494_v23 }
 0x29c   :  { %v1070_v18 = vmul.f32 %v2484_v35, %v1063_v44 }
 0x29e   :  { %v2449_v28 = vpop.permute.xlu1 %1076  ;;  %v2451_v52 = vpop.permute.xlu0 %1106 }
 0x29f   :  { %v1079_v47 = vsel %vm1078_vm7, %v2443_v62, %v2449_v28  ;;  %v1080_v12 = vsel %vm1078_vm7, %v2449_v28, %v2443_v62  ;;  %v2989_v62 = vcombine.high %v2484_v35, %v2484_v35  ;;  %v1040_v28 = vadd.f32 %v1038_v29, %v2423_v42 }
 0x2a0   :  { %v1086_v46 = vmul.f32 %v2494_v23, %v1079_v47  ;;  %v1087_v35 = vmul.f32 %v2990_v31, %v1080_v12  ;;  %v2993_v47 = vcombine.high %v2519_v20, %v2519_v20 }
 0x2a1   :  { %v1071_v3 = vmul.f32 %v2989_v62, %v1064_v24 }
 0x2a2   :  { %v2453_v6 = vpop.permute.xlu1 %1092  ;;  %v2455_v7 = vpop.permute.xlu0 %1122 }
 0x2a3   :  { %v1095_v13 = vsel %vm1094_vm8, %v2447_v57, %v2453_v6  ;;  %v1096_v34 = vsel %vm1094_vm8, %v2453_v6, %v2447_v57  ;;  %v1041_v6 = vadd.f32 %v1039_v40, %v2425_v59  ;;  %v2992_v59 = vcombine.high %v2508_v26, %v2508_v26 }
 0x2a4   :  { %v1102_v32 = vmul.f32 %v2503_v58, %v1095_v13  ;;  %v1103_v44 = vmul.f32 %v2991_v36, %v1096_v34  ;;  %v1072_v40 = vadd.f32 %v1070_v18, %v1008_v37  ;;  %v1073_v24 = vadd.f32 %v1071_v3, %v1009_v39 }
 0x2a5   :  { %v2994_v39 = vcombine.high %v2527_v55, %v2527_v55  ;;  %v2996_v36 = vcombine.high %v2532_v2, %v2532_v2 }
 0x2a6   :  { %v2457_v33 = vpop.permute.xlu1 %1108  ;;  %v2459_v19 = vpop.permute.xlu0 %1138  ;;  %v1105_v34 = vadd.f32 %v1103_v44, %v1041_v6 }
 0x2a7   :  { %v1111_v30 = vsel %vm1110_vm9, %v2451_v52, %v2457_v33  ;;  %v1112_v57 = vsel %vm1110_vm9, %v2457_v33, %v2451_v52 }
 0x2a8   :  { %v1118_v23 = vmul.f32 %v2508_v26, %v1111_v30  ;;  %v1119_v52 = vmul.f32 %v2992_v59, %v1112_v57 }
 0x2aa   :  { %v2461_v49 = vpop.permute.xlu1 %1124  ;;  %v2463_v53 = vpop.permute.xlu0 %1154 }
 0x2ab   :  { %v1127_v29 = vsel %vm1126_vm10, %v2455_v7, %v2461_v49  ;;  %v1128_v42 = vsel %vm1126_vm10, %v2461_v49, %v2455_v7  ;;  %v1056_v7 = vadd.f32 %v1054_v45, %v2429_v38  ;;  %v1057_v49 = vadd.f32 %v1055_v5, %v2431_v16 }
 0x2ac   :  { %v1134_v26 = vmul.f32 %v2519_v20, %v1127_v29  ;;  %v1135_v12 = vmul.f32 %v2993_v47, %v1128_v42  ;;  %v1088_v45 = vadd.f32 %v1086_v46, %v1024_v61  ;;  %v1089_v16 = vadd.f32 %v1087_v35, %v1025_v43 }
 0x2ad   :  { %v1104_v20 = vadd.f32 %v1102_v32, %v1040_v28  ;;  %v1120_v18 = vadd.f32 %v1118_v23, %v1056_v7  ;;  %v1121_v62 = vadd.f32 %v1119_v52, %v1057_v49  ;;  %v2995_v46 = vcombine.high %v2552_v63, %v2552_v63 }
 0x2ae   :  { %v2486_v10 = vpop.permute.xlu1 %1140  ;;  %v2488_v1 = vpop.permute.xlu0 %1170  ;;  %v1136_v61 = vadd.f32 %v1134_v26, %v1072_v40  ;;  %v1137_v43 = vadd.f32 %v1135_v12, %v1073_v24  ;;  %v2997_v52 = vcombine.high %v2557_v0, %v2557_v0 }
 0x2af   :  { %v1143_v58 = vsel %vm1142_vm11, %v2459_v19, %v2486_v10  ;;  %v1144_v33 = vsel %vm1142_vm11, %v2486_v10, %v2459_v19 }
 0x2b0   :  { %v1150_v37 = vmul.f32 %v2527_v55, %v1143_v58  ;;  %v1151_v5 = vmul.f32 %v2994_v39, %v1144_v33 }
 0x2b2   :  { %v2534_v54 = vpop.permute.xlu1 %1156  ;;  %v2536_v14 = vpop.permute.xlu0 %1186  ;;  %v1152_v57 = vadd.f32 %v1150_v37, %v1088_v45  ;;  %v1153_v28 = vadd.f32 %v1151_v5, %v1089_v16 }
 0x2b3   :  { %v1159_v30 = vsel %vm1158_vm14, %v2463_v53, %v2534_v54 }
 0x2b4   :  { %v1166_v32 = vmul.f32 %v2532_v2, %v1159_v30 }
 0x2b6   :  { %v1173_v60 = vpop.permute.xlu1 %1172  ;;  %v2595_v25 = vpop.permute.xlu0 %1202  ;;  %v1168_v24 = vadd.f32 %v1166_v32, %v1104_v20 }
 0x2b7   :  { %v1175_v13 = vsel %vm1174_vm12, %v2488_v1, %v1173_v60  ;;  %v1176_v10 = vsel %vm1174_vm12, %v1173_v60, %v2488_v1 }
 0x2b8   :  { %v1182_v3 = vmul.f32 %v2547_v21, %v1175_v13  ;;  %v1183_v1 = vmul.f32 %v1180_v51, %v1176_v10  ;;  %v1160_v21 = vsel %vm1158_vm14, %v2534_v54, %v2463_v53 }
 0x2b9   :  { %v1167_v44 = vmul.f32 %v2996_v36, %v1160_v21 }
 0x2ba   :  { %v1189_v17 = vpop.permute.xlu1 %1188  ;;  %v2658_v50 = vpop.permute.xlu0 %1218  ;;  %v1184_v29 = vadd.f32 %v1182_v3, %v1120_v18  ;;  %v1185_v42 = vadd.f32 %v1183_v1, %v1121_v62 }
 0x2bb   :  { %v1191_v60 = vsel %vm1190_vm13, %v2536_v14, %v1189_v17  ;;  %v1192_v55 = vsel %vm1190_vm13, %v1189_v17, %v2536_v14  ;;  %v1169_v26 = vadd.f32 %v1167_v44, %v1105_v34 }
 0x2bc   :  { %v1198_v17 = vmul.f32 %v2552_v63, %v1191_v60  ;;  %v1199_v31 = vmul.f32 %v2995_v46, %v1192_v55 }
 0x2be   :  { %v1205_v22 = vpop.permute.xlu1 %1204  ;;  %v1235_v19 = vpop.permute.xlu0 %1234  ;;  %v1201_v49 = vadd.f32 %v1199_v31, %v1137_v43 }
 0x2bf   :  { %v1207_v35 = vsel %vm1206_vm0, %v2595_v25, %v1205_v22  ;;  %v1208_v54 = vsel %vm1206_vm0, %v1205_v22, %v2595_v25 }
 0x2c0   :  { %v1214_v2 = vmul.f32 %v2557_v0, %v1207_v35  ;;  %v1215_v58 = vmul.f32 %v2997_v52, %v1208_v54  ;;  %v2999_v0 = vcombine.high %v2571_v48, %v2571_v48  ;;  %v3003_v52 = vld [vmem:[#allocation7_spill] sm:$0xff] }
 0x2c2   :  { %v1221_v38 = vpop.permute.xlu1 %1220  ;;  %v1251_v53 = vpop.permute.xlu0 %1250  ;;  %v1216_v37 = vadd.f32 %v1214_v2, %v1152_v57  ;;  %v1217_v39 = vadd.f32 %v1215_v58, %v1153_v28 }
 0x2c3   :  { %v1223_v63 = vsel %vm1222_vm1, %v2658_v50, %v1221_v38  ;;  %v1224_v23 = vsel %vm1222_vm1, %v1221_v38, %v2658_v50  ;;  %v1200_v50 = vadd.f32 %v1198_v17, %v1136_v61 }
 0x2c4   :  { %v1230_v47 = vmul.f32 %v2571_v48, %v1223_v63  ;;  %v1231_v12 = vmul.f32 %v2999_v0, %v1224_v23  ;;  %v3009_v0 = vld [vmem:[#allocation22_spill] sm:$0xff] }
 0x2c6   :  { %v1237_v51 = vpop.permute.xlu1 %1236  ;;  %v1232_v62 = vadd.f32 %v1230_v47, %v1168_v24  ;;  %v1233_v3 = vadd.f32 %v1231_v12, %v1169_v26  ;;  %v3008_v26 = vld [vmem:[#allocation19_spill] sm:$0xff] }
 0x2c7   :  { %v1239_v6 = vsel %vm1238_vm15, %v1235_v19, %v1237_v51  ;;  %v1240_v14 = vsel %vm1238_vm15, %v1237_v51, %v1235_v19  ;;  %v1267_v19 = vpop.permute.xlu0 %1266  ;;  %v3010_v12 = vld [vmem:[#allocation23_spill] sm:$0xff] }
 0x2c8   :  { %v1246_v59 = vmul.f32 %v2579_v4, %v1239_v6  ;;  %v1247_v25 = vmul.f32 %v1244_v41, %v1240_v14  ;;  %v2998_v41 = vcombine.high %v2584_v11, %v2584_v11  ;;  %v3000_v14 = vlaneseq }
 0x2ca   :  { %v1253_v22 = vpop.permute.xlu1 %1252  ;;  %v1248_v13 = vadd.f32 %v1246_v59, %v1184_v29  ;;  %v1249_v10 = vadd.f32 %v1247_v25, %v1185_v42  ;;  %v1305_v17 = vshrl.u32 %v3000_v14, 7  ;;  %v3001_v59 = vld [vmem:[#allocation10_spill] sm:$0xff]  ;;  %v3025_v14 = vld [vmem:[#allocation20_spill] sm:$0xff] }
 0x2cb   :  { %v1255_v33 = vsel %vm1254_vm2, %v1251_v53, %v1253_v22  ;;  %v1256_v7 = vsel %vm1254_vm2, %v1253_v22, %v1251_v53  ;;  %v3002_v22 = vld [vmem:[#allocation14_spill] sm:$0xff] }
 0x2cc   :  { %v1262_v40 = vmul.f32 %v2584_v11, %v1255_v33  ;;  %v1263_v4 = vmul.f32 %v2998_v41, %v1256_v7  ;;  %v1306_v46 = vsub.s32 0, %v1305_v17  ;;  %v1346_v35 = vsub.s32 1, %v1305_v17  ;;  %v3004_v33 = vld [vmem:[#allocation6_spill] sm:$0xff] }
 0x2ce   :  { %v1264_v38 = vadd.f32 %v1262_v40, %v1200_v50  ;;  %v1265_v45 = vadd.f32 %v1263_v4, %v1201_v49  ;;  %v1269_v16 = vpop.permute.xlu1 %1268  ;;  %v3005_v50 = vld [vmem:[#allocation11_spill] sm:$0xff]  ;;  %v3007_v4 = vld [vmem:[#allocation18_spill] sm:$0xff] }
 0x2cf   :  { %v1271_v11 = vsel %vm1270_vm3, %v1267_v19, %v1269_v16  ;;  %v1272_v5 = vsel %vm1270_vm3, %v1269_v16, %v1267_v19  ;;  %v3006_v40 = vld [vmem:[#allocation15_spill] sm:$0xff] }
 0x2d0   :  { %v1284_v20 = vadd.f32 %v1264_v38, %v1248_v13  ;;  %v1285_v34 = vadd.f32 %v1265_v45, %v1249_v10  ;;  %v1278_v18 = vmul.f32 %v2589_v9, %v1271_v11  ;;  %v1279_v48 = vmul.f32 %v1276_v56, %v1272_v5  ;;  %v3011_v13 = vld [vmem:[#allocation26_spill] sm:$0xff]  ;;  %v3012_v19 = vld [vmem:[#allocation27_spill] sm:$0xff]  ;;  %v3015_v11 = vld [vmem:[#allocation4_spill] sm:$0xff] }
 0x2d1   :  { %v3013_v45 = vld [vmem:[#allocation30_spill] sm:$0xff] }
 0x2d2   :  { %v1280_v1 = vadd.f32 %v1278_v18, %v1216_v37  ;;  %v1281_v60 = vadd.f32 %v1279_v48, %v1217_v39  ;;  %v3014_v37 = vld [vmem:[#allocation31_spill] sm:$0xff]  ;;  %v3017_v18 = vld [vmem:[#allocation2_spill] sm:$0xff] }
 0x2d4   :  { %v1282_v55 = vadd.f32 %v1280_v1, %v1232_v62  ;;  %v1283_v61 = vadd.f32 %v1281_v60, %v1233_v3  ;;  %v3018_v62 = vld [vmem:[#allocation3_spill] sm:$0xff]  ;;  %v3019_v1 = vld [vmem:[#allocation8_spill] sm:$0xff] }
 0x2d6   :  { %v1286_v43 = vadd.f32 %v1284_v20, %v1282_v55  ;;  %v1287_v30 = vadd.f32 %v1285_v34, %v1283_v61  ;;  %v3016_v20 = vld [vmem:[#allocation5_spill] sm:$0xff] }
 0x2d7   :  { %v3020_v55 = vld [vmem:[#allocation9_spill] sm:$0xff] }
 0x2d8   :  { %v1290_v21 = vrot.slane %v1286_v43, 2  ;;  %v1291_v51 = vrot.slane %v1287_v30, 2 }
 0x2da   :  { %v1294_v27 = vadd.f32 %v1290_v21, %v1286_v43  ;;  %v1295_v57 = vadd.f32 %v1291_v51, %v1287_v30  ;;  %v3021_v43 = vld [vmem:[#allocation12_spill] sm:$0xff]  ;;  %v3022_v21 = vld [vmem:[#allocation13_spill] sm:$0xff] }
 0x2dc   :  { %v1296_v28 = vmul.f32 0.5, %v1294_v27  ;;  %v1297_v6 = vmul.f32 0.5, %v1295_v57  ;;  %v3023_v27 = vld [vmem:[#allocation16_spill] sm:$0xff] }
 0x2de   :  { %1598 = vtanh.f32 %v1296_v28  ;;  %v3024_v28 = vld [vmem:[#allocation17_spill] sm:$0xff] }
 0x2df   :  { %1600 = vtanh.f32 %v1297_v6 }
 0x2e8   :  { %v1599_v9 = vpop.eup %1598 }
 0x2e9   :  { %v1601_v56 = vpop.eup %1600  ;;  %v1300_v31 = vmul.f32 0.5, %v1599_v9  ;;  %v3026_v9 = vld [vmem:[#allocation21_spill] sm:$0xff] }
 0x2ea   :  { %v1301_v54 = vmul.f32 0.5, %v1601_v56 }
 0x2eb   :  { %v1302_v53 = vadd.f32 0.5, %v1300_v31 }
 0x2ec   :  { %v1303_v32 = vadd.f32 0.5, %v1301_v54 }
 0x2ed   :  { %v1307_v36 = vrot.slane %v1302_v53, %v1306_v46  ;;  %v1347_v29 = vrot.slane %v1302_v53, %v1346_v35  ;;  %v3029_v53 = vld [vmem:[#allocation28_spill] sm:$0xff] }
 0x2ee   :  { %v1311_v44 = vrot.slane %v1303_v32, %v1306_v46  ;;  %v1351_v42 = vrot.slane %v1303_v32, %v1346_v35  ;;  %v3027_v46 = vld [vmem:[#allocation24_spill] sm:$0xff]  ;;  %v3028_v35 = vld [vmem:[#allocation25_spill] sm:$0xff] }
 0x2ef   :  { %v1312_v63 = vmul.f32 %v1307_v36, %v2016_v15  ;;  %v1314_v23 = vmul.f32 %v1307_v36, %v2001_v8  ;;  %v1316_v25 = vmul.f32 %v1307_v36, %v3001_v59  ;;  %v1318_v2 = vmul.f32 %v1307_v36, %v3002_v22 }
 0x2f0   :  { %v1313_v58 = vmul.f32 %v1311_v44, %v3003_v52  ;;  %v1315_v7 = vmul.f32 %v1311_v44, %v3004_v33  ;;  %v1317_v49 = vmul.f32 %v1311_v44, %v3005_v50  ;;  %v1319_v41 = vmul.f32 %v1311_v44, %v3006_v40 }
 0x2f1   :  { %v1320_v24 = vmul.f32 %v1307_v36, %v3007_v4  ;;  %v1321_v47 = vmul.f32 %v1311_v44, %v3008_v26  ;;  %v1322_v15 = vmul.f32 %v1307_v36, %v3009_v0  ;;  %v1323_v8 = vmul.f32 %v1311_v44, %v3010_v12  ;;  %1328 = vst [vmem:[%s2927_s5] sm:$0xff] %v1312_v63 }
 0x2f2   :  { %1330 = vst [vmem:[%s2927_s5 + $0x10] sm:$0xff] %v1314_v23  ;;  %1332 = vst [vmem:[%s2927_s5 + $0x20] sm:$0xff] %v1316_v25  ;;  %v1324_v10 = vmul.f32 %v1307_v36, %v3011_v13  ;;  %v1325_v38 = vmul.f32 %v1311_v44, %v3012_v19  ;;  %v1326_v16 = vmul.f32 %v1307_v36, %v3013_v45  ;;  %v3030_v36 = vld [vmem:[#allocation29_spill] sm:$0xff] }
 0x2f3   :  { %1334 = vst [vmem:[%s2927_s5 + $0x30] sm:$0xff] %v1318_v2  ;;  %v1327_v39 = vmul.f32 %v1311_v44, %v3014_v37  ;;  %1329 = vst [vmem:[%s2927_s5 + $0x8] sm:$0xff] %v1313_v58  ;;  %v1352_v5 = vmul.f32 %v1347_v29, %v3015_v11  ;;  %v1353_v34 = vmul.f32 %v1351_v42, %v3016_v20 }
 0x2f4   :  { %1331 = vst [vmem:[%s2927_s5 + $0x18] sm:$0xff] %v1315_v7  ;;  %1333 = vst [vmem:[%s2927_s5 + $0x28] sm:$0xff] %v1317_v49  ;;  %v1354_v48 = vmul.f32 %v1347_v29, %v3017_v18  ;;  %v1355_v3 = vmul.f32 %v1351_v42, %v3018_v62  ;;  %v1356_v60 = vmul.f32 %v1347_v29, %v3019_v1 }
 0x2f5   :  { %1335 = vst [vmem:[%s2927_s5 + $0x38] sm:$0xff] %v1319_v41  ;;  %1336 = vst [vmem:[%s2927_s5 + $0x40] sm:$0xff] %v1320_v24  ;;  %v1357_v61 = vmul.f32 %v1351_v42, %v3020_v55  ;;  %v1358_v30 = vmul.f32 %v1347_v29, %v3021_v43  ;;  %v1359_v51 = vmul.f32 %v1351_v42, %v3022_v21 }
 0x2f6   :  { %1337 = vst [vmem:[%s2927_s5 + $0x48] sm:$0xff] %v1321_v47  ;;  %1338 = vst [vmem:[%s2927_s5 + $0x50] sm:$0xff] %v1322_v15  ;;  %v1360_v57 = vmul.f32 %v1347_v29, %v3023_v27  ;;  %v1361_v6 = vmul.f32 %v1351_v42, %v3024_v28  ;;  %v1362_v17 = vmul.f32 %v1347_v29, %v3025_v14 }
 0x2f7   :  { %1339 = vst [vmem:[%s2927_s5 + $0x58] sm:$0xff] %v1323_v8  ;;  %1340 = vst [vmem:[%s2927_s5 + $0x60] sm:$0xff] %v1324_v10  ;;  %v1363_v56 = vmul.f32 %v1351_v42, %v3026_v9  ;;  %v1364_v31 = vmul.f32 %v1347_v29, %v3027_v46  ;;  %v1365_v54 = vmul.f32 %v1351_v42, %v3028_v35 }
 0x2f8   :  { %1341 = vst [vmem:[%s2927_s5 + $0x68] sm:$0xff] %v1325_v38  ;;  %1342 = vst [vmem:[%s2927_s5 + $0x70] sm:$0xff] %v1326_v16  ;;  %v1366_v32 = vmul.f32 %v1347_v29, %v3029_v53  ;;  %v1367_v44 = vmul.f32 %v1351_v42, %v3030_v36 }
 0x2f9   :  { %1343 = vst [vmem:[%s2927_s5 + $0x78] sm:$0xff] %v1327_v39  ;;  %1453 = vst [vmem:[%s2927_s5 + $0x80] sm:$0xff] %v1352_v5 }
 0x2fa   :  { %1454 = vst [vmem:[%s2927_s5 + $0x88] sm:$0xff] %v1353_v34  ;;  %1455 = vst [vmem:[%s2927_s5 + $0x90] sm:$0xff] %v1354_v48 }
 0x2fb   :  { %1456 = vst [vmem:[%s2927_s5 + $0x98] sm:$0xff] %v1355_v3  ;;  %1457 = vst [vmem:[%s2927_s5 + $0xa0] sm:$0xff] %v1356_v60 }
 0x2fc   :  { %1458 = vst [vmem:[%s2927_s5 + $0xa8] sm:$0xff] %v1357_v61  ;;  %1459 = vst [vmem:[%s2927_s5 + $0xb0] sm:$0xff] %v1358_v30 }
 0x2fd   :  { %1460 = vst [vmem:[%s2927_s5 + $0xb8] sm:$0xff] %v1359_v51  ;;  %1461 = vst [vmem:[%s2927_s5 + $0xc0] sm:$0xff] %v1360_v57 }
 0x2fe   :  { %1462 = vst [vmem:[%s2927_s5 + $0xc8] sm:$0xff] %v1361_v6  ;;  %1463 = vst [vmem:[%s2927_s5 + $0xd0] sm:$0xff] %v1362_v17 }
 0x2ff   :  { %1464 = vst [vmem:[%s2927_s5 + $0xd8] sm:$0xff] %v1363_v56  ;;  %1465 = vst [vmem:[%s2927_s5 + $0xe0] sm:$0xff] %v1364_v31 }
 0x300   :  { %1466 = vst [vmem:[%s2927_s5 + $0xe8] sm:$0xff] %v1365_v54  ;;  %1467 = vst [vmem:[%s2927_s5 + $0xf0] sm:$0xff] %v1366_v32 }
 0x301   :  { %1468 = vst [vmem:[%s2927_s5 + $0xf8] sm:$0xff] %v1367_v44 }

</bundles_post_ra>
